<compile_context>
chip_gen: v5e
topology: v5e:2x2
jax: 0.10.0
libtpu: 0.0.40
codegen_flags: <defaults>
</compile_context>

<pallas_src>
import jax
import jax.numpy as jnp
from jax import lax
from jax.experimental import pallas as pl
from jax.experimental.pallas import tpu as pltpu

LANE = 128
SUBLANE = 8


def _round_up(x, m):
    return ((x + m - 1) // m) * m


def _pad_gate_cols(w, H, Hp):
    """[..., 4*H] -> [..., 4*Hp]: zero-pad each gate block to Hp lanes."""
    pads = [(0, 0)] * (w.ndim - 1) + [(0, Hp - H)]
    blocks = [jnp.pad(w[..., g * H:(g + 1) * H], pads) for g in range(4)]
    return jnp.concatenate(blocks, axis=-1)


# -----------------------------------------------------------------------------
# Kernel
# -----------------------------------------------------------------------------
def _make_kernel(seq_len, time_chunk, unroll):
    """Bakes the static sequence length / chunking into the kernel body."""

    masked_tail = (seq_len % time_chunk) != 0   # static: last chunk has pad steps

    def kernel(x_ref, gxe_ref, wf_ref, whh_ref, w1_ref, b1_ref, w2_ref, b2_ref,
               out_ref, gx_ref, h_ref, c_ref):
        # x_ref   : [TL, TB, F]   f32   time-major feature chunk (this batch tile)
        # gxe_ref : [TL, G4]      f32   batch-invariant emb @ W_ih_emb + (b_ih+b_hh)
        # wf_ref  : [F, G4]       bf16  feature rows of W_ih (gate-padded to 128/gate)
        # whh_ref : [Hp, G4]      bf16  recurrent weights (row- and gate-padded)
        # w1_ref  : [Hp, Hp] bf16, b1_ref [1, Hp] f32   (tail linear 1)
        # w2_ref  : [Hp, Op] bf16, b2_ref [1, Op] f32   (tail linear 2, pad = -1e30)
        # out_ref : [TB, Op]      f32
        # gx_ref  : [TL, TB, G4]  bf16  scratch: hoisted input-gate terms, this chunk
        # h_ref/c_ref : [TB, Hp]  f32   persistent LSTM state across time chunks
        TL, TB, F = x_ref.shape
        Hp, G4 = whh_ref.shape
        tc = pl.program_id(1)

        @pl.when(tc == 0)
        def _init():
            h_ref[...] = jnp.zeros_like(h_ref)
            c_ref[...] = jnp.zeros_like(c_ref)

        # Hoisted input projection for this chunk: one [TL*TB, F] x [F, G4] MXU
        # matmul, entirely off the serial path. The batch-invariant embedding +
        # bias term arrives precomputed from the wrapper (never redone per tile).
        xf = x_ref[...].reshape(TL * TB, F).astype(jnp.bfloat16)
        gx = jnp.dot(xf, wf_ref[...], preferred_element_type=jnp.float32)
        gx = gx.reshape(TL, TB, G4) + gxe_ref[...][:, None, :]
        gx_ref[...] = gx.astype(gx_ref.dtype)     # bf16 store: halves gx VMEM/traffic

        # LSTM recurrence: only h @ W_hh per step; gates are lane-aligned (each
        # gate is a whole 128-lane block). Padded lanes stay exactly 0 because
        # their weights/bias are 0.
        def step(t, carry):
            h, c = carry
            gates = gx_ref[t].astype(jnp.float32) + jnp.dot(
                h.astype(jnp.bfloat16), whh_ref[...],
                preferred_element_type=jnp.float32)          # [TB, G4]
            i_g = jax.nn.sigmoid(gates[:, 0 * Hp:1 * Hp])
            f_g = jax.nn.sigmoid(gates[:, 1 * Hp:2 * Hp])
            g_g = jnp.tanh(gates[:, 2 * Hp:3 * Hp])
            o_g = jax.nn.sigmoid(gates[:, 3 * Hp:4 * Hp])
            c_new = f_g * c + i_g * g_g
            h_new = o_g * jnp.tanh(c_new)
            if masked_tail:
                # freeze state on padded timesteps of the last chunk
                valid = (tc * time_chunk + t) < seq_len
                h_new = jnp.where(valid, h_new, h)
                c_new = jnp.where(valid, c_new, c)
            return h_new, c_new

        h, c = lax.fori_loop(0, TL, step, (h_ref[...], c_ref[...]), unroll=unroll)
        h_ref[...] = h
        c_ref[...] = c

        # Tail: Dropout(identity, eval) -> Linear -> LeakyReLU(0.1) -> Linear -> Softmax
        @pl.when(tc == pl.num_programs(1) - 1)
        def _finish():
            z1 = jnp.dot(h.astype(jnp.bfloat16), w1_ref[...],
                         preferred_element_type=jnp.float32) + b1_ref[...]   # [TB, Hp]
            z1 = jnp.where(z1 >= 0, z1, 0.1 * z1)
            z2 = jnp.dot(z1.astype(jnp.bfloat16), w2_ref[...],
                         preferred_element_type=jnp.float32) + b2_ref[...]   # [TB, Op]
            m = jnp.max(z2, axis=-1, keepdims=True)        # padded cols hold -1e30
            e = jnp.exp(z2 - m)                            # exactly 0 in padded cols
            s = jnp.sum(e, axis=-1, keepdims=True)
            out_ref[...] = e * pl.reciprocal(s, approx=False)   # exact normalization

    return kernel


# -----------------------------------------------------------------------------
# Parameter helpers
# -----------------------------------------------------------------------------
def init_params(key, num_embeddings, embedding_size, features_size,
                hidden_size, out_size):
    D = embedding_size + features_size
    H = hidden_size
    ks = jax.random.split(key, 8)
    s = 1.0 / jnp.sqrt(H)
    return dict(
        embedding=jax.random.normal(ks[0], (num_embeddings, embedding_size),
                                    jnp.float32),
        # PyTorch LSTM params in transposed layout, gate order i, f, g, o.
        # Row order of w_ih matches the concat order (features | embedding).
        w_ih=jax.random.uniform(ks[1], (D, 4 * H), jnp.float32, -s, s),
        w_hh=jax.random.uniform(ks[2], (H, 4 * H), jnp.float32, -s, s),
        b=jax.random.uniform(ks[3], (4 * H,), jnp.float32, -s, s),  # b_ih + b_hh folded
        w1=jax.random.uniform(ks[4], (H, H), jnp.float32, -s, s),
        b1=jax.random.uniform(ks[5], (H,), jnp.float32, -s, s),
        w2=jax.random.uniform(ks[6], (H, out_size), jnp.float32, -s, s),
        b2=jax.random.uniform(ks[7], (out_size,), jnp.float32, -s, s),
    )


# -----------------------------------------------------------------------------
# Wrapper
# -----------------------------------------------------------------------------
def punct_network_embedding_forward(features, vocab_ids, params, *,
                                    tb_max=128, tl_max=64,
                                    vmem_limit_bytes=48 * 1024 * 1024):
    """features: [B, L, F] f32, vocab_ids: [L] int32 -> [B, out_size] f32."""
    B, L, F = features.shape
    H = params["w_hh"].shape[0]
    O = params["w2"].shape[1]

    Hp = _round_up(H, LANE)               # lane-aligned per-gate width
    Op = _round_up(O, LANE)               # lane-dense output width
    G4 = 4 * Hp

    # ---- batch tile: as large as the batch allows (amortizes the serial
    # recurrence and per-grid-step overhead), sublane-aligned, capped at tb_max.
    TB = min(tb_max, _round_up(B, SUBLANE))
    Bp = _round_up(B, TB)
    # TODO(synk): on v7x, when B is large prefer Bp//TB >= 2 so the "parallel"
    #             batch axis can split across both TensorCores.

    # ---- time chunk: largest TL <= tl_max whose VMEM footprint fits the budget
    # (keeps the kernel inside v7x's 64 MiB as well as the explicit scoped limit).
    def _vmem_estimate(tl):
        f_pad = _round_up(F, LANE)                # feature tile is lane-padded in VMEM
        x_blk = tl * TB * f_pad * 4 * 2           # f32, double-buffered
        gxe_blk = tl * G4 * 4 * 2                 # f32, double-buffered
        gx_scr = tl * TB * G4 * 2                 # bf16 scratch (single buffer)
        weights = (F * G4 + Hp * G4 + Hp * Hp + Hp * Op) * 2 * 2   # bf16, dbl-buffered
        biases = (G4 + Hp + Op) * 4 * 2
        state = 2 * TB * Hp * 4
        out_blk = TB * Op * 4 * 2
        return x_blk + gxe_blk + gx_scr + weights + biases + state + out_blk

    TL = min(tl_max, L)
    while TL > SUBLANE and _vmem_estimate(TL) > int(0.85 * vmem_limit_bytes):
        TL //= 2
    Lp = _round_up(L, TL)

    # ---- plain-JAX glue: gather, batch-invariant gate term, padding -----------
    emb = jnp.take(params["embedding"], vocab_ids, axis=0).astype(jnp.float32)   # [L, E]
    # Batch-invariant embedding gate term + folded biases, computed ONCE in XLA
    # (previously recomputed inside the kernel for every batch tile).
    gxe = emb @ params["w_ih"][F:] + params["b"]                                  # [L, 4H]
    gxe = _pad_gate_cols(gxe, H, Hp)                                              # [L, G4]
    gxe = jnp.pad(gxe, ((0, Lp - L), (0, 0))).astype(jnp.float32)                 # [Lp, G4]

    xf = jnp.transpose(features.astype(jnp.float32), (1, 0, 2))                   # [L, B, F]
    xf = jnp.pad(xf, ((0, Lp - L), (0, Bp - B), (0, 0)))                          # [Lp, Bp, F]

    # ---- padded / bf16 parameters (gate-padded so gate slices are vreg-aligned)
    wf = _pad_gate_cols(params["w_ih"][:F], H, Hp).astype(jnp.bfloat16)           # [F, G4]
    whh = jnp.pad(_pad_gate_cols(params["w_hh"], H, Hp),
                  ((0, Hp - H), (0, 0))).astype(jnp.bfloat16)                      # [Hp, G4]
    w1 = jnp.pad(params["w1"], ((0, Hp - H), (0, Hp - H))).astype(jnp.bfloat16)
    b1 = jnp.pad(params["b1"][None, :], ((0, 0), (0, Hp - H))).astype(jnp.float32)
    w2 = jnp.pad(params["w2"], ((0, Hp - H), (0, Op - O))).astype(jnp.bfloat16)
    b2 = jnp.pad(params["b2"][None, :], ((0, 0), (0, Op - O)),
                 constant_values=-1e30).astype(jnp.float32)   # mask padded logits (f32)

    kernel = _make_kernel(seq_len=L, time_chunk=TL, unroll=min(8, TL))

    grid = (Bp // TB, Lp // TL)           # (batch tiles "parallel", time "arbitrary")
    out_padded = pl.pallas_call(
        kernel,
        out_shape=jax.ShapeDtypeStruct((Bp, Op), jnp.float32),
        grid_spec=pltpu.PrefetchScalarGridSpec(
            num_scalar_prefetch=0,
            grid=grid,
            in_specs=[
                pl.BlockSpec((TL, TB, F), lambda i, t: (t, i, 0)),   # feature chunk
                pl.BlockSpec((TL, G4), lambda i, t: (t, 0)),         # emb gate term
                # Grid-invariant weights: block index never changes, so they are
                # only DMA'd once (see TODO about single-buffering their VMEM).
                pl.BlockSpec((F, G4), lambda i, t: (0, 0)),          # W_ih (features)
                pl.BlockSpec((Hp, G4), lambda i, t: (0, 0)),         # W_hh
                pl.BlockSpec((Hp, Hp), lambda i, t: (0, 0)),         # W1
                pl.BlockSpec((1, Hp), lambda i, t: (0, 0)),          # b1
                pl.BlockSpec((Hp, Op), lambda i, t: (0, 0)),         # W2
                pl.BlockSpec((1, Op), lambda i, t: (0, 0)),          # b2
            ],
            out_specs=pl.BlockSpec((TB, Op), lambda i, t: (i, 0)),
            scratch_shapes=[
                pltpu.VMEM((TL, TB, G4), jnp.bfloat16),   # gx chunk (bf16 halves VMEM)
                pltpu.VMEM((TB, Hp), jnp.float32),        # h (persists across chunks)
                pltpu.VMEM((TB, Hp), jnp.float32),        # c (persists across chunks)
            ],
        ),
        compiler_params=pltpu.CompilerParams(
            dimension_semantics=("parallel", "arbitrary"),
            vmem_limit_bytes=vmem_limit_bytes),
    )(xf, gxe, wf, whh, w1, b1, w2, b2)

    return out_padded[:B, :O]


# -----------------------------------------------------------------------------
# Pure-JAX reference (f32) for a sanity check
# -----------------------------------------------------------------------------
def reference_forward(features, vocab_ids, params):
    B, L, F = features.shape
    H = params["w_hh"].shape[0]
    emb = jnp.take(params["embedding"], vocab_ids, axis=0)
    emb_b = jnp.broadcast_to(emb[None], (B, L, emb.shape[-1]))
    x = jnp.concatenate([features, emb_b], axis=2)           # [B, L, D]

    def step(carry, x_t):
        h, c = carry
        g = x_t @ params["w_ih"] + h @ params["w_hh"] + params["b"]
        i = jax.nn.sigmoid(g[:, 0 * H:1 * H])
        f = jax.nn.sigmoid(g[:, 1 * H:2 * H])
        gg = jnp.tanh(g[:, 2 * H:3 * H])
        o = jax.nn.sigmoid(g[:, 3 * H:4 * H])
        c = f * c + i * gg
        h = o * jnp.tanh(c)
        return (h, c), None

    h0 = jnp.zeros((B, H), jnp.float32)
    (h, _), _ = lax.scan(step, (h0, h0), jnp.transpose(x, (1, 0, 2)))
    z1 = h @ params["w1"] + params["b1"]
    z1 = jnp.where(z1 >= 0, z1, 0.1 * z1)
    z2 = z1 @ params["w2"] + params["b2"]
    return jax.nn.softmax(z2, axis=1)


if __name__ == "__main__":
    B, L = 2, 8                 # batch, sequence length
    features_size = 4
    embedding_size = 12         # -> LSTM input D = 16
    hidden_size = 32
    out_size = 4
    num_embeddings = 100

    key = jax.random.PRNGKey(0)
    k_feat, k_ids, k_par = jax.random.split(key, 3)

    features = jax.random.normal(k_feat, (B, L, features_size), jnp.float32)
    vocab_ids = jax.random.randint(k_ids, (L,), 0, num_embeddings, jnp.int32)
    params = init_params(k_par, num_embeddings, embedding_size, features_size,
                         hidden_size, out_size)

    out = punct_network_embedding_forward(features, vocab_ids, params)
    out = jax.block_until_ready(out)

    assert out.shape == (B, out_size)
    # softmax rows sum to 1 (exact reciprocal)
    assert jnp.allclose(jnp.sum(out, axis=1), 1.0, atol=1e-4)
    # matches the f32 reference within bf16 tolerance
    ref = reference_forward(features, vocab_ids, params)
    assert jnp.allclose(out, ref, atol=5e-2)
    print("KERNEL_OK")
</pallas_src>

<mosaic_0001>
module attributes {stable_mosaic.version = 11 : i64} {
  func.func @kernel(%arg0: i32, %arg1: i32, %arg2: memref<8x8x4xf32, #tpu.memory_space<vmem>>, %arg3: memref<8x512xf32, #tpu.memory_space<vmem>>, %arg4: memref<4x512xbf16, #tpu.memory_space<vmem>>, %arg5: memref<128x512xbf16, #tpu.memory_space<vmem>>, %arg6: memref<128x128xbf16, #tpu.memory_space<vmem>>, %arg7: memref<1x128xf32, #tpu.memory_space<vmem>>, %arg8: memref<128x128xbf16, #tpu.memory_space<vmem>>, %arg9: memref<1x128xf32, #tpu.memory_space<vmem>>, %arg10: memref<8x128xf32, #tpu.memory_space<vmem>>, %arg11: memref<8x8x512xbf16, #tpu.memory_space<vmem>>, %arg12: memref<8x128xf32, #tpu.memory_space<vmem>>, %arg13: memref<8x128xf32, #tpu.memory_space<vmem>>) attributes {dimension_semantics = [#tpu.dimension_semantics<parallel>, #tpu.dimension_semantics<arbitrary>], iteration_bounds = array<i64: 1, 1>, scalar_prefetch = 0 : i64, scratch_operands = 3 : i64, tpu.core_type = #tpu.core_type<tc>, window_params = [{transform_indices = @transform_0, window_bounds = array<i64: 8, 8, 4>}, {transform_indices = @transform_1, window_bounds = array<i64: 8, 512>}, {pipeline_mode = #tpu.pipeline_mode<synchronous>, transform_indices = @transform_2, window_bounds = array<i64: 4, 512>}, {pipeline_mode = #tpu.pipeline_mode<synchronous>, transform_indices = @transform_3, window_bounds = array<i64: 128, 512>}, {pipeline_mode = #tpu.pipeline_mode<synchronous>, transform_indices = @transform_4, window_bounds = array<i64: 128, 128>}, {pipeline_mode = #tpu.pipeline_mode<synchronous>, transform_indices = @transform_5, window_bounds = array<i64: 1, 128>}, {pipeline_mode = #tpu.pipeline_mode<synchronous>, transform_indices = @transform_6, window_bounds = array<i64: 128, 128>}, {pipeline_mode = #tpu.pipeline_mode<synchronous>, transform_indices = @transform_7, window_bounds = array<i64: 1, 128>}, {transform_indices = @transform_8, window_bounds = array<i64: 8, 128>}]} {
    %c0_i32 = arith.constant 0 : i32
    %0 = arith.cmpi eq, %arg1, %c0_i32 : i32
    %1 = arith.extui %0 : i1 to i32
    %c0_i32_0 = arith.constant 0 : i32
    %2 = arith.cmpi ne, %1, %c0_i32_0 : i32
    scf.if %2 {
      %cst_85 = arith.constant 0.000000e+00 : f32
      %286 = vector.broadcast %cst_85 : f32 to vector<8x128xf32>
      %c0_86 = arith.constant 0 : index
      %c0_87 = arith.constant 0 : index
      %287 = vector.load %arg12[%c0_86, %c0_87] : memref<8x128xf32, #tpu.memory_space<vmem>>, vector<8x128xf32>
      tpu.vector_store %arg12[%c0_86, %c0_87], %286 {strides = array<i32>} : memref<8x128xf32, #tpu.memory_space<vmem>>, vector<8x128xf32>,
      %cst_88 = arith.constant 0.000000e+00 : f32
      %288 = vector.broadcast %cst_88 : f32 to vector<8x128xf32>
      %c0_89 = arith.constant 0 : index
      %c0_90 = arith.constant 0 : index
      %289 = vector.load %arg13[%c0_89, %c0_90] : memref<8x128xf32, #tpu.memory_space<vmem>>, vector<8x128xf32>
      tpu.vector_store %arg13[%c0_89, %c0_90], %288 {strides = array<i32>} : memref<8x128xf32, #tpu.memory_space<vmem>>, vector<8x128xf32>,
    } else {
    }
    %c0 = arith.constant 0 : index
    %c0_1 = arith.constant 0 : index
    %c0_2 = arith.constant 0 : index
    %3 = vector.load %arg2[%c0, %c0_1, %c0_2] : memref<8x8x4xf32, #tpu.memory_space<vmem>>, vector<8x8x4xf32>
    %4 = vector.shape_cast %3 : vector<8x8x4xf32> to vector<64x4xf32>
    %5 = arith.truncf %4 : vector<64x4xf32> to vector<64x4xbf16>
    %c0_3 = arith.constant 0 : index
    %c0_4 = arith.constant 0 : index
    %6 = vector.load %arg4[%c0_3, %c0_4] : memref<4x512xbf16, #tpu.memory_space<vmem>>, vector<4x512xbf16>
    %cst = arith.constant dense<0.000000e+00> : vector<64x512xf32>
    %7 = tpu.matmul %5, %6, %cst {dimension_numbers = #tpu.dot_dimension_numbers<[1], [0], [0], [1], [0, 0, 1, 1], [], []>} : vector<64x4xbf16>, vector<4x512xbf16>, vector<64x512xf32> -> vector<64x512xf32>
    %8 = vector.shape_cast %7 : vector<64x512xf32> to vector<8x8x512xf32>
    %c0_5 = arith.constant 0 : index
    %c0_6 = arith.constant 0 : index
    %9 = vector.load %arg3[%c0_5, %c0_6] : memref<8x512xf32, #tpu.memory_space<vmem>>, vector<8x512xf32>
    %10 = vector.shape_cast %9 : vector<8x512xf32> to vector<8x1x512xf32>
    %11 = vector.broadcast %10 : vector<8x1x512xf32> to vector<8x8x512xf32>
    %12 = arith.addf %8, %11 : vector<8x8x512xf32>
    %13 = arith.truncf %12 : vector<8x8x512xf32> to vector<8x8x512xbf16>
    %c0_7 = arith.constant 0 : index
    %c0_8 = arith.constant 0 : index
    %c0_9 = arith.constant 0 : index
    %14 = vector.load %arg11[%c0_7, %c0_8, %c0_9] : memref<8x8x512xbf16, #tpu.memory_space<vmem>>, vector<8x8x512xbf16>
    tpu.vector_store %arg11[%c0_7, %c0_8, %c0_9], %13 {strides = array<i32>} : memref<8x8x512xbf16, #tpu.memory_space<vmem>>, vector<8x8x512xbf16>,
    %c0_10 = arith.constant 0 : index
    %c0_11 = arith.constant 0 : index
    %15 = vector.load %arg12[%c0_10, %c0_11] : memref<8x128xf32, #tpu.memory_space<vmem>>, vector<8x128xf32>
    %c0_12 = arith.constant 0 : index
    %c0_13 = arith.constant 0 : index
    %16 = vector.load %arg13[%c0_12, %c0_13] : memref<8x128xf32, #tpu.memory_space<vmem>>, vector<8x128xf32>
    %c0_i32_14 = arith.constant 0 : i32
    %17 = arith.index_cast %c0_i32_14 : i32 to index
    %c0_15 = arith.constant 0 : index
    %c0_16 = arith.constant 0 : index
    %18 = vector.load %arg11[%17, %c0_15, %c0_16] : memref<8x8x512xbf16, #tpu.memory_space<vmem>>, vector<1x8x512xbf16>
    %19 = vector.shape_cast %18 : vector<1x8x512xbf16> to vector<8x512xbf16>
    %20 = arith.extf %19 : vector<8x512xbf16> to vector<8x512xf32>
    %21 = arith.truncf %15 : vector<8x128xf32> to vector<8x128xbf16>
    %c0_17 = arith.constant 0 : index
    %c0_18 = arith.constant 0 : index
    %22 = vector.load %arg5[%c0_17, %c0_18] : memref<128x512xbf16, #tpu.memory_space<vmem>>, vector<128x512xbf16>
    %cst_19 = arith.constant dense<0.000000e+00> : vector<8x512xf32>
    %23 = tpu.matmul %21, %22, %cst_19 {dimension_numbers = #tpu.dot_dimension_numbers<[1], [0], [0], [1], [0, 0, 1, 1], [], []>} : vector<8x128xbf16>, vector<128x512xbf16>, vector<8x512xf32> -> vector<8x512xf32>
    %24 = arith.addf %20, %23 : vector<8x512xf32>
    %25 = vector.extract_strided_slice %24 {offsets = [0, 0], sizes = [8, 128], strides = [1, 1]} : vector<8x512xf32> to vector<8x128xf32>
    %26 = arith.negf %25 : vector<8x128xf32>
    %27 = math.exp %26 : vector<8x128xf32>
    %cst_20 = arith.constant 1.000000e+00 : f32
    %28 = vector.broadcast %cst_20 : f32 to vector<8x128xf32>
    %29 = arith.addf %28, %27 : vector<8x128xf32>
    %30 = arith.divf %28, %29 : vector<8x128xf32>
    %31 = vector.extract_strided_slice %24 {offsets = [0, 128], sizes = [8, 128], strides = [1, 1]} : vector<8x512xf32> to vector<8x128xf32>
    %32 = arith.negf %31 : vector<8x128xf32>
    %33 = math.exp %32 : vector<8x128xf32>
    %cst_21 = arith.constant 1.000000e+00 : f32
    %34 = vector.broadcast %cst_21 : f32 to vector<8x128xf32>
    %35 = arith.addf %34, %33 : vector<8x128xf32>
    %36 = arith.divf %34, %35 : vector<8x128xf32>
    %37 = vector.extract_strided_slice %24 {offsets = [0, 256], sizes = [8, 128], strides = [1, 1]} : vector<8x512xf32> to vector<8x128xf32>
    %38 = math.tanh %37 : vector<8x128xf32>
    %39 = vector.extract_strided_slice %24 {offsets = [0, 384], sizes = [8, 128], strides = [1, 1]} : vector<8x512xf32> to vector<8x128xf32>
    %40 = arith.negf %39 : vector<8x128xf32>
    %41 = math.exp %40 : vector<8x128xf32>
    %cst_22 = arith.constant 1.000000e+00 : f32
    %42 = vector.broadcast %cst_22 : f32 to vector<8x128xf32>
    %43 = arith.addf %42, %41 : vector<8x128xf32>
    %44 = arith.divf %42, %43 : vector<8x128xf32>
    %45 = arith.mulf %36, %16 : vector<8x128xf32>
    %46 = arith.mulf %30, %38 : vector<8x128xf32>
    %47 = arith.addf %45, %46 : vector<8x128xf32>
    %48 = math.tanh %47 : vector<8x128xf32>
    %49 = arith.mulf %44, %48 : vector<8x128xf32>
    %c1_i32 = arith.constant 1 : i32
    %50 = arith.index_cast %c1_i32 : i32 to index
    %c0_23 = arith.constant 0 : index
    %c0_24 = arith.constant 0 : index
    %51 = vector.load %arg11[%50, %c0_23, %c0_24] : memref<8x8x512xbf16, #tpu.memory_space<vmem>>, vector<1x8x512xbf16>
    %52 = vector.shape_cast %51 : vector<1x8x512xbf16> to vector<8x512xbf16>
    %53 = arith.extf %52 : vector<8x512xbf16> to vector<8x512xf32>
    %54 = arith.truncf %49 : vector<8x128xf32> to vector<8x128xbf16>
    %c0_25 = arith.constant 0 : index
    %c0_26 = arith.constant 0 : index
    %55 = vector.load %arg5[%c0_25, %c0_26] : memref<128x512xbf16, #tpu.memory_space<vmem>>, vector<128x512xbf16>
    %cst_27 = arith.constant dense<0.000000e+00> : vector<8x512xf32>
    %56 = tpu.matmul %54, %55, %cst_27 {dimension_numbers = #tpu.dot_dimension_numbers<[1], [0], [0], [1], [0, 0, 1, 1], [], []>} : vector<8x128xbf16>, vector<128x512xbf16>, vector<8x512xf32> -> vector<8x512xf32>
    %57 = arith.addf %53, %56 : vector<8x512xf32>
    %58 = vector.extract_strided_slice %57 {offsets = [0, 0], sizes = [8, 128], strides = [1, 1]} : vector<8x512xf32> to vector<8x128xf32>
    %59 = arith.negf %58 : vector<8x128xf32>
    %60 = math.exp %59 : vector<8x128xf32>
    %cst_28 = arith.constant 1.000000e+00 : f32
    %61 = vector.broadcast %cst_28 : f32 to vector<8x128xf32>
    %62 = arith.addf %61, %60 : vector<8x128xf32>
    %63 = arith.divf %61, %62 : vector<8x128xf32>
    %64 = vector.extract_strided_slice %57 {offsets = [0, 128], sizes = [8, 128], strides = [1, 1]} : vector<8x512xf32> to vector<8x128xf32>
    %65 = arith.negf %64 : vector<8x128xf32>
    %66 = math.exp %65 : vector<8x128xf32>
    %cst_29 = arith.constant 1.000000e+00 : f32
    %67 = vector.broadcast %cst_29 : f32 to vector<8x128xf32>
    %68 = arith.addf %67, %66 : vector<8x128xf32>
    %69 = arith.divf %67, %68 : vector<8x128xf32>
    %70 = vector.extract_strided_slice %57 {offsets = [0, 256], sizes = [8, 128], strides = [1, 1]} : vector<8x512xf32> to vector<8x128xf32>
    %71 = math.tanh %70 : vector<8x128xf32>
    %72 = vector.extract_strided_slice %57 {offsets = [0, 384], sizes = [8, 128], strides = [1, 1]} : vector<8x512xf32> to vector<8x128xf32>
    %73 = arith.negf %72 : vector<8x128xf32>
    %74 = math.exp %73 : vector<8x128xf32>
    %cst_30 = arith.constant 1.000000e+00 : f32
    %75 = vector.broadcast %cst_30 : f32 to vector<8x128xf32>
    %76 = arith.addf %75, %74 : vector<8x128xf32>
    %77 = arith.divf %75, %76 : vector<8x128xf32>
    %78 = arith.mulf %69, %47 : vector<8x128xf32>
    %79 = arith.mulf %63, %71 : vector<8x128xf32>
    %80 = arith.addf %78, %79 : vector<8x128xf32>
    %81 = math.tanh %80 : vector<8x128xf32>
    %82 = arith.mulf %77, %81 : vector<8x128xf32>
    %c2_i32 = arith.constant 2 : i32
    %83 = arith.index_cast %c2_i32 : i32 to index
    %c0_31 = arith.constant 0 : index
    %c0_32 = arith.constant 0 : index
    %84 = vector.load %arg11[%83, %c0_31, %c0_32] : memref<8x8x512xbf16, #tpu.memory_space<vmem>>, vector<1x8x512xbf16>
    %85 = vector.shape_cast %84 : vector<1x8x512xbf16> to vector<8x512xbf16>
    %86 = arith.extf %85 : vector<8x512xbf16> to vector<8x512xf32>
    %87 = arith.truncf %82 : vector<8x128xf32> to vector<8x128xbf16>
    %c0_33 = arith.constant 0 : index
    %c0_34 = arith.constant 0 : index
    %88 = vector.load %arg5[%c0_33, %c0_34] : memref<128x512xbf16, #tpu.memory_space<vmem>>, vector<128x512xbf16>
    %cst_35 = arith.constant dense<0.000000e+00> : vector<8x512xf32>
    %89 = tpu.matmul %87, %88, %cst_35 {dimension_numbers = #tpu.dot_dimension_numbers<[1], [0], [0], [1], [0, 0, 1, 1], [], []>} : vector<8x128xbf16>, vector<128x512xbf16>, vector<8x512xf32> -> vector<8x512xf32>
    %90 = arith.addf %86, %89 : vector<8x512xf32>
    %91 = vector.extract_strided_slice %90 {offsets = [0, 0], sizes = [8, 128], strides = [1, 1]} : vector<8x512xf32> to vector<8x128xf32>
    %92 = arith.negf %91 : vector<8x128xf32>
    %93 = math.exp %92 : vector<8x128xf32>
    %cst_36 = arith.constant 1.000000e+00 : f32
    %94 = vector.broadcast %cst_36 : f32 to vector<8x128xf32>
    %95 = arith.addf %94, %93 : vector<8x128xf32>
    %96 = arith.divf %94, %95 : vector<8x128xf32>
    %97 = vector.extract_strided_slice %90 {offsets = [0, 128], sizes = [8, 128], strides = [1, 1]} : vector<8x512xf32> to vector<8x128xf32>
    %98 = arith.negf %97 : vector<8x128xf32>
    %99 = math.exp %98 : vector<8x128xf32>
    %cst_37 = arith.constant 1.000000e+00 : f32
    %100 = vector.broadcast %cst_37 : f32 to vector<8x128xf32>
    %101 = arith.addf %100, %99 : vector<8x128xf32>
    %102 = arith.divf %100, %101 : vector<8x128xf32>
    %103 = vector.extract_strided_slice %90 {offsets = [0, 256], sizes = [8, 128], strides = [1, 1]} : vector<8x512xf32> to vector<8x128xf32>
    %104 = math.tanh %103 : vector<8x128xf32>
    %105 = vector.extract_strided_slice %90 {offsets = [0, 384], sizes = [8, 128], strides = [1, 1]} : vector<8x512xf32> to vector<8x128xf32>
    %106 = arith.negf %105 : vector<8x128xf32>
    %107 = math.exp %106 : vector<8x128xf32>
    %cst_38 = arith.constant 1.000000e+00 : f32
    %108 = vector.broadcast %cst_38 : f32 to vector<8x128xf32>
    %109 = arith.addf %108, %107 : vector<8x128xf32>
    %110 = arith.divf %108, %109 : vector<8x128xf32>
    %111 = arith.mulf %102, %80 : vector<8x128xf32>
    %112 = arith.mulf %96, %104 : vector<8x128xf32>
    %113 = arith.addf %111, %112 : vector<8x128xf32>
    %114 = math.tanh %113 : vector<8x128xf32>
    %115 = arith.mulf %110, %114 : vector<8x128xf32>
    %c3_i32 = arith.constant 3 : i32
    %116 = arith.index_cast %c3_i32 : i32 to index
    %c0_39 = arith.constant 0 : index
    %c0_40 = arith.constant 0 : index
    %117 = vector.load %arg11[%116, %c0_39, %c0_40] : memref<8x8x512xbf16, #tpu.memory_space<vmem>>, vector<1x8x512xbf16>
    %118 = vector.shape_cast %117 : vector<1x8x512xbf16> to vector<8x512xbf16>
    %119 = arith.extf %118 : vector<8x512xbf16> to vector<8x512xf32>
    %120 = arith.truncf %115 : vector<8x128xf32> to vector<8x128xbf16>
    %c0_41 = arith.constant 0 : index
    %c0_42 = arith.constant 0 : index
    %121 = vector.load %arg5[%c0_41, %c0_42] : memref<128x512xbf16, #tpu.memory_space<vmem>>, vector<128x512xbf16>
    %cst_43 = arith.constant dense<0.000000e+00> : vector<8x512xf32>
    %122 = tpu.matmul %120, %121, %cst_43 {dimension_numbers = #tpu.dot_dimension_numbers<[1], [0], [0], [1], [0, 0, 1, 1], [], []>} : vector<8x128xbf16>, vector<128x512xbf16>, vector<8x512xf32> -> vector<8x512xf32>
    %123 = arith.addf %119, %122 : vector<8x512xf32>
    %124 = vector.extract_strided_slice %123 {offsets = [0, 0], sizes = [8, 128], strides = [1, 1]} : vector<8x512xf32> to vector<8x128xf32>
    %125 = arith.negf %124 : vector<8x128xf32>
    %126 = math.exp %125 : vector<8x128xf32>
    %cst_44 = arith.constant 1.000000e+00 : f32
    %127 = vector.broadcast %cst_44 : f32 to vector<8x128xf32>
    %128 = arith.addf %127, %126 : vector<8x128xf32>
    %129 = arith.divf %127, %128 : vector<8x128xf32>
    %130 = vector.extract_strided_slice %123 {offsets = [0, 128], sizes = [8, 128], strides = [1, 1]} : vector<8x512xf32> to vector<8x128xf32>
    %131 = arith.negf %130 : vector<8x128xf32>
    %132 = math.exp %131 : vector<8x128xf32>
    %cst_45 = arith.constant 1.000000e+00 : f32
    %133 = vector.broadcast %cst_45 : f32 to vector<8x128xf32>
    %134 = arith.addf %133, %132 : vector<8x128xf32>
    %135 = arith.divf %133, %134 : vector<8x128xf32>
    %136 = vector.extract_strided_slice %123 {offsets = [0, 256], sizes = [8, 128], strides = [1, 1]} : vector<8x512xf32> to vector<8x128xf32>
    %137 = math.tanh %136 : vector<8x128xf32>
    %138 = vector.extract_strided_slice %123 {offsets = [0, 384], sizes = [8, 128], strides = [1, 1]} : vector<8x512xf32> to vector<8x128xf32>
    %139 = arith.negf %138 : vector<8x128xf32>
    %140 = math.exp %139 : vector<8x128xf32>
    %cst_46 = arith.constant 1.000000e+00 : f32
    %141 = vector.broadcast %cst_46 : f32 to vector<8x128xf32>
    %142 = arith.addf %141, %140 : vector<8x128xf32>
    %143 = arith.divf %141, %142 : vector<8x128xf32>
    %144 = arith.mulf %135, %113 : vector<8x128xf32>
    %145 = arith.mulf %129, %137 : vector<8x128xf32>
    %146 = arith.addf %144, %145 : vector<8x128xf32>
    %147 = math.tanh %146 : vector<8x128xf32>
    %148 = arith.mulf %143, %147 : vector<8x128xf32>
    %c4_i32 = arith.constant 4 : i32
    %149 = arith.index_cast %c4_i32 : i32 to index
    %c0_47 = arith.constant 0 : index
    %c0_48 = arith.constant 0 : index
    %150 = vector.load %arg11[%149, %c0_47, %c0_48] : memref<8x8x512xbf16, #tpu.memory_space<vmem>>, vector<1x8x512xbf16>
    %151 = vector.shape_cast %150 : vector<1x8x512xbf16> to vector<8x512xbf16>
    %152 = arith.extf %151 : vector<8x512xbf16> to vector<8x512xf32>
    %153 = arith.truncf %148 : vector<8x128xf32> to vector<8x128xbf16>
    %c0_49 = arith.constant 0 : index
    %c0_50 = arith.constant 0 : index
    %154 = vector.load %arg5[%c0_49, %c0_50] : memref<128x512xbf16, #tpu.memory_space<vmem>>, vector<128x512xbf16>
    %cst_51 = arith.constant dense<0.000000e+00> : vector<8x512xf32>
    %155 = tpu.matmul %153, %154, %cst_51 {dimension_numbers = #tpu.dot_dimension_numbers<[1], [0], [0], [1], [0, 0, 1, 1], [], []>} : vector<8x128xbf16>, vector<128x512xbf16>, vector<8x512xf32> -> vector<8x512xf32>
    %156 = arith.addf %152, %155 : vector<8x512xf32>
    %157 = vector.extract_strided_slice %156 {offsets = [0, 0], sizes = [8, 128], strides = [1, 1]} : vector<8x512xf32> to vector<8x128xf32>
    %158 = arith.negf %157 : vector<8x128xf32>
    %159 = math.exp %158 : vector<8x128xf32>
    %cst_52 = arith.constant 1.000000e+00 : f32
    %160 = vector.broadcast %cst_52 : f32 to vector<8x128xf32>
    %161 = arith.addf %160, %159 : vector<8x128xf32>
    %162 = arith.divf %160, %161 : vector<8x128xf32>
    %163 = vector.extract_strided_slice %156 {offsets = [0, 128], sizes = [8, 128], strides = [1, 1]} : vector<8x512xf32> to vector<8x128xf32>
    %164 = arith.negf %163 : vector<8x128xf32>
    %165 = math.exp %164 : vector<8x128xf32>
    %cst_53 = arith.constant 1.000000e+00 : f32
    %166 = vector.broadcast %cst_53 : f32 to vector<8x128xf32>
    %167 = arith.addf %166, %165 : vector<8x128xf32>
    %168 = arith.divf %166, %167 : vector<8x128xf32>
    %169 = vector.extract_strided_slice %156 {offsets = [0, 256], sizes = [8, 128], strides = [1, 1]} : vector<8x512xf32> to vector<8x128xf32>
    %170 = math.tanh %169 : vector<8x128xf32>
    %171 = vector.extract_strided_slice %156 {offsets = [0, 384], sizes = [8, 128], strides = [1, 1]} : vector<8x512xf32> to vector<8x128xf32>
    %172 = arith.negf %171 : vector<8x128xf32>
    %173 = math.exp %172 : vector<8x128xf32>
    %cst_54 = arith.constant 1.000000e+00 : f32
    %174 = vector.broadcast %cst_54 : f32 to vector<8x128xf32>
    %175 = arith.addf %174, %173 : vector<8x128xf32>
    %176 = arith.divf %174, %175 : vector<8x128xf32>
    %177 = arith.mulf %168, %146 : vector<8x128xf32>
    %178 = arith.mulf %162, %170 : vector<8x128xf32>
    %179 = arith.addf %177, %178 : vector<8x128xf32>
    %180 = math.tanh %179 : vector<8x128xf32>
    %181 = arith.mulf %176, %180 : vector<8x128xf32>
    %c5_i32 = arith.constant 5 : i32
    %182 = arith.index_cast %c5_i32 : i32 to index
    %c0_55 = arith.constant 0 : index
    %c0_56 = arith.constant 0 : index
    %183 = vector.load %arg11[%182, %c0_55, %c0_56] : memref<8x8x512xbf16, #tpu.memory_space<vmem>>, vector<1x8x512xbf16>
    %184 = vector.shape_cast %183 : vector<1x8x512xbf16> to vector<8x512xbf16>
    %185 = arith.extf %184 : vector<8x512xbf16> to vector<8x512xf32>
    %186 = arith.truncf %181 : vector<8x128xf32> to vector<8x128xbf16>
    %c0_57 = arith.constant 0 : index
    %c0_58 = arith.constant 0 : index
    %187 = vector.load %arg5[%c0_57, %c0_58] : memref<128x512xbf16, #tpu.memory_space<vmem>>, vector<128x512xbf16>
    %cst_59 = arith.constant dense<0.000000e+00> : vector<8x512xf32>
    %188 = tpu.matmul %186, %187, %cst_59 {dimension_numbers = #tpu.dot_dimension_numbers<[1], [0], [0], [1], [0, 0, 1, 1], [], []>} : vector<8x128xbf16>, vector<128x512xbf16>, vector<8x512xf32> -> vector<8x512xf32>
    %189 = arith.addf %185, %188 : vector<8x512xf32>
    %190 = vector.extract_strided_slice %189 {offsets = [0, 0], sizes = [8, 128], strides = [1, 1]} : vector<8x512xf32> to vector<8x128xf32>
    %191 = arith.negf %190 : vector<8x128xf32>
    %192 = math.exp %191 : vector<8x128xf32>
    %cst_60 = arith.constant 1.000000e+00 : f32
    %193 = vector.broadcast %cst_60 : f32 to vector<8x128xf32>
    %194 = arith.addf %193, %192 : vector<8x128xf32>
    %195 = arith.divf %193, %194 : vector<8x128xf32>
    %196 = vector.extract_strided_slice %189 {offsets = [0, 128], sizes = [8, 128], strides = [1, 1]} : vector<8x512xf32> to vector<8x128xf32>
    %197 = arith.negf %196 : vector<8x128xf32>
    %198 = math.exp %197 : vector<8x128xf32>
    %cst_61 = arith.constant 1.000000e+00 : f32
    %199 = vector.broadcast %cst_61 : f32 to vector<8x128xf32>
    %200 = arith.addf %199, %198 : vector<8x128xf32>
    %201 = arith.divf %199, %200 : vector<8x128xf32>
    %202 = vector.extract_strided_slice %189 {offsets = [0, 256], sizes = [8, 128], strides = [1, 1]} : vector<8x512xf32> to vector<8x128xf32>
    %203 = math.tanh %202 : vector<8x128xf32>
    %204 = vector.extract_strided_slice %189 {offsets = [0, 384], sizes = [8, 128], strides = [1, 1]} : vector<8x512xf32> to vector<8x128xf32>
    %205 = arith.negf %204 : vector<8x128xf32>
    %206 = math.exp %205 : vector<8x128xf32>
    %cst_62 = arith.constant 1.000000e+00 : f32
    %207 = vector.broadcast %cst_62 : f32 to vector<8x128xf32>
    %208 = arith.addf %207, %206 : vector<8x128xf32>
    %209 = arith.divf %207, %208 : vector<8x128xf32>
    %210 = arith.mulf %201, %179 : vector<8x128xf32>
    %211 = arith.mulf %195, %203 : vector<8x128xf32>
    %212 = arith.addf %210, %211 : vector<8x128xf32>
    %213 = math.tanh %212 : vector<8x128xf32>
    %214 = arith.mulf %209, %213 : vector<8x128xf32>
    %c6_i32 = arith.constant 6 : i32
    %215 = arith.index_cast %c6_i32 : i32 to index
    %c0_63 = arith.constant 0 : index
    %c0_64 = arith.constant 0 : index
    %216 = vector.load %arg11[%215, %c0_63, %c0_64] : memref<8x8x512xbf16, #tpu.memory_space<vmem>>, vector<1x8x512xbf16>
    %217 = vector.shape_cast %216 : vector<1x8x512xbf16> to vector<8x512xbf16>
    %218 = arith.extf %217 : vector<8x512xbf16> to vector<8x512xf32>
    %219 = arith.truncf %214 : vector<8x128xf32> to vector<8x128xbf16>
    %c0_65 = arith.constant 0 : index
    %c0_66 = arith.constant 0 : index
    %220 = vector.load %arg5[%c0_65, %c0_66] : memref<128x512xbf16, #tpu.memory_space<vmem>>, vector<128x512xbf16>
    %cst_67 = arith.constant dense<0.000000e+00> : vector<8x512xf32>
    %221 = tpu.matmul %219, %220, %cst_67 {dimension_numbers = #tpu.dot_dimension_numbers<[1], [0], [0], [1], [0, 0, 1, 1], [], []>} : vector<8x128xbf16>, vector<128x512xbf16>, vector<8x512xf32> -> vector<8x512xf32>
    %222 = arith.addf %218, %221 : vector<8x512xf32>
    %223 = vector.extract_strided_slice %222 {offsets = [0, 0], sizes = [8, 128], strides = [1, 1]} : vector<8x512xf32> to vector<8x128xf32>
    %224 = arith.negf %223 : vector<8x128xf32>
    %225 = math.exp %224 : vector<8x128xf32>
    %cst_68 = arith.constant 1.000000e+00 : f32
    %226 = vector.broadcast %cst_68 : f32 to vector<8x128xf32>
    %227 = arith.addf %226, %225 : vector<8x128xf32>
    %228 = arith.divf %226, %227 : vector<8x128xf32>
    %229 = vector.extract_strided_slice %222 {offsets = [0, 128], sizes = [8, 128], strides = [1, 1]} : vector<8x512xf32> to vector<8x128xf32>
    %230 = arith.negf %229 : vector<8x128xf32>
    %231 = math.exp %230 : vector<8x128xf32>
    %cst_69 = arith.constant 1.000000e+00 : f32
    %232 = vector.broadcast %cst_69 : f32 to vector<8x128xf32>
    %233 = arith.addf %232, %231 : vector<8x128xf32>
    %234 = arith.divf %232, %233 : vector<8x128xf32>
    %235 = vector.extract_strided_slice %222 {offsets = [0, 256], sizes = [8, 128], strides = [1, 1]} : vector<8x512xf32> to vector<8x128xf32>
    %236 = math.tanh %235 : vector<8x128xf32>
    %237 = vector.extract_strided_slice %222 {offsets = [0, 384], sizes = [8, 128], strides = [1, 1]} : vector<8x512xf32> to vector<8x128xf32>
    %238 = arith.negf %237 : vector<8x128xf32>
    %239 = math.exp %238 : vector<8x128xf32>
    %cst_70 = arith.constant 1.000000e+00 : f32
    %240 = vector.broadcast %cst_70 : f32 to vector<8x128xf32>
    %241 = arith.addf %240, %239 : vector<8x128xf32>
    %242 = arith.divf %240, %241 : vector<8x128xf32>
    %243 = arith.mulf %234, %212 : vector<8x128xf32>
    %244 = arith.mulf %228, %236 : vector<8x128xf32>
    %245 = arith.addf %243, %244 : vector<8x128xf32>
    %246 = math.tanh %245 : vector<8x128xf32>
    %247 = arith.mulf %242, %246 : vector<8x128xf32>
    %c7_i32 = arith.constant 7 : i32
    %248 = arith.index_cast %c7_i32 : i32 to index
    %c0_71 = arith.constant 0 : index
    %c0_72 = arith.constant 0 : index
    %249 = vector.load %arg11[%248, %c0_71, %c0_72] : memref<8x8x512xbf16, #tpu.memory_space<vmem>>, vector<1x8x512xbf16>
    %250 = vector.shape_cast %249 : vector<1x8x512xbf16> to vector<8x512xbf16>
    %251 = arith.extf %250 : vector<8x512xbf16> to vector<8x512xf32>
    %252 = arith.truncf %247 : vector<8x128xf32> to vector<8x128xbf16>
    %c0_73 = arith.constant 0 : index
    %c0_74 = arith.constant 0 : index
    %253 = vector.load %arg5[%c0_73, %c0_74] : memref<128x512xbf16, #tpu.memory_space<vmem>>, vector<128x512xbf16>
    %cst_75 = arith.constant dense<0.000000e+00> : vector<8x512xf32>
    %254 = tpu.matmul %252, %253, %cst_75 {dimension_numbers = #tpu.dot_dimension_numbers<[1], [0], [0], [1], [0, 0, 1, 1], [], []>} : vector<8x128xbf16>, vector<128x512xbf16>, vector<8x512xf32> -> vector<8x512xf32>
    %255 = arith.addf %251, %254 : vector<8x512xf32>
    %256 = vector.extract_strided_slice %255 {offsets = [0, 0], sizes = [8, 128], strides = [1, 1]} : vector<8x512xf32> to vector<8x128xf32>
    %257 = arith.negf %256 : vector<8x128xf32>
    %258 = math.exp %257 : vector<8x128xf32>
    %cst_76 = arith.constant 1.000000e+00 : f32
    %259 = vector.broadcast %cst_76 : f32 to vector<8x128xf32>
    %260 = arith.addf %259, %258 : vector<8x128xf32>
    %261 = arith.divf %259, %260 : vector<8x128xf32>
    %262 = vector.extract_strided_slice %255 {offsets = [0, 128], sizes = [8, 128], strides = [1, 1]} : vector<8x512xf32> to vector<8x128xf32>
    %263 = arith.negf %262 : vector<8x128xf32>
    %264 = math.exp %263 : vector<8x128xf32>
    %cst_77 = arith.constant 1.000000e+00 : f32
    %265 = vector.broadcast %cst_77 : f32 to vector<8x128xf32>
    %266 = arith.addf %265, %264 : vector<8x128xf32>
    %267 = arith.divf %265, %266 : vector<8x128xf32>
    %268 = vector.extract_strided_slice %255 {offsets = [0, 256], sizes = [8, 128], strides = [1, 1]} : vector<8x512xf32> to vector<8x128xf32>
    %269 = math.tanh %268 : vector<8x128xf32>
    %270 = vector.extract_strided_slice %255 {offsets = [0, 384], sizes = [8, 128], strides = [1, 1]} : vector<8x512xf32> to vector<8x128xf32>
    %271 = arith.negf %270 : vector<8x128xf32>
    %272 = math.exp %271 : vector<8x128xf32>
    %cst_78 = arith.constant 1.000000e+00 : f32
    %273 = vector.broadcast %cst_78 : f32 to vector<8x128xf32>
    %274 = arith.addf %273, %272 : vector<8x128xf32>
    %275 = arith.divf %273, %274 : vector<8x128xf32>
    %276 = arith.mulf %267, %245 : vector<8x128xf32>
    %277 = arith.mulf %261, %269 : vector<8x128xf32>
    %278 = arith.addf %276, %277 : vector<8x128xf32>
    %279 = math.tanh %278 : vector<8x128xf32>
    %280 = arith.mulf %275, %279 : vector<8x128xf32>
    %c8_i32 = arith.constant 8 : i32
    %c0_79 = arith.constant 0 : index
    %c0_80 = arith.constant 0 : index
    %281 = vector.load %arg12[%c0_79, %c0_80] : memref<8x128xf32, #tpu.memory_space<vmem>>, vector<8x128xf32>
    tpu.vector_store %arg12[%c0_79, %c0_80], %280 {strides = array<i32>} : memref<8x128xf32, #tpu.memory_space<vmem>>, vector<8x128xf32>,
    %c0_81 = arith.constant 0 : index
    %c0_82 = arith.constant 0 : index
    %282 = vector.load %arg13[%c0_81, %c0_82] : memref<8x128xf32, #tpu.memory_space<vmem>>, vector<8x128xf32>
    tpu.vector_store %arg13[%c0_81, %c0_82], %278 {strides = array<i32>} : memref<8x128xf32, #tpu.memory_space<vmem>>, vector<8x128xf32>,
    %c0_i32_83 = arith.constant 0 : i32
    %283 = arith.cmpi eq, %arg1, %c0_i32_83 : i32
    %284 = arith.extui %283 : i1 to i32
    %c0_i32_84 = arith.constant 0 : i32
    %285 = arith.cmpi ne, %284, %c0_i32_84 : i32
    scf.if %285 {
      %286 = arith.truncf %280 : vector<8x128xf32> to vector<8x128xbf16>
      %c0_85 = arith.constant 0 : index
      %c0_86 = arith.constant 0 : index
      %287 = vector.load %arg6[%c0_85, %c0_86] : memref<128x128xbf16, #tpu.memory_space<vmem>>, vector<128x128xbf16>
      %cst_87 = arith.constant dense<0.000000e+00> : vector<8x128xf32>
      %288 = tpu.matmul %286, %287, %cst_87 {dimension_numbers = #tpu.dot_dimension_numbers<[1], [0], [0], [1], [0, 0, 1, 1], [], []>} : vector<8x128xbf16>, vector<128x128xbf16>, vector<8x128xf32> -> vector<8x128xf32>
      %c0_88 = arith.constant 0 : index
      %c0_89 = arith.constant 0 : index
      %289 = vector.load %arg7[%c0_88, %c0_89] : memref<1x128xf32, #tpu.memory_space<vmem>>, vector<1x128xf32>
      %290 = vector.broadcast %289 : vector<1x128xf32> to vector<8x128xf32>
      %291 = arith.addf %288, %290 : vector<8x128xf32>
      %cst_90 = arith.constant 0.000000e+00 : f32
      %292 = vector.broadcast %cst_90 : f32 to vector<8x128xf32>
      %293 = arith.cmpf oge, %291, %292 : vector<8x128xf32>
      %cst_91 = arith.constant 1.000000e-01 : f32
      %294 = vector.broadcast %cst_91 : f32 to vector<8x128xf32>
      %295 = arith.mulf %294, %291 : vector<8x128xf32>
      %296 = arith.select %293, %291, %295 : vector<8x128xi1>, vector<8x128xf32>
      %297 = arith.truncf %296 : vector<8x128xf32> to vector<8x128xbf16>
      %c0_92 = arith.constant 0 : index
      %c0_93 = arith.constant 0 : index
      %298 = vector.load %arg8[%c0_92, %c0_93] : memref<128x128xbf16, #tpu.memory_space<vmem>>, vector<128x128xbf16>
      %cst_94 = arith.constant dense<0.000000e+00> : vector<8x128xf32>
      %299 = tpu.matmul %297, %298, %cst_94 {dimension_numbers = #tpu.dot_dimension_numbers<[1], [0], [0], [1], [0, 0, 1, 1], [], []>} : vector<8x128xbf16>, vector<128x128xbf16>, vector<8x128xf32> -> vector<8x128xf32>
      %c0_95 = arith.constant 0 : index
      %c0_96 = arith.constant 0 : index
      %300 = vector.load %arg9[%c0_95, %c0_96] : memref<1x128xf32, #tpu.memory_space<vmem>>, vector<1x128xf32>
      %301 = vector.broadcast %300 : vector<1x128xf32> to vector<8x128xf32>
      %302 = arith.addf %299, %301 : vector<8x128xf32>
      %cst_97 = arith.constant dense<0xFF800000> : vector<8xf32>
      %303 = vector.multi_reduction <maximumf>, %302, %cst_97 [1] : vector<8x128xf32> to vector<8xf32>
      %304 = vector.shape_cast %303 : vector<8xf32> to vector<8x1xf32>
      %305 = vector.broadcast %304 : vector<8x1xf32> to vector<8x128xf32>
      %306 = arith.subf %302, %305 : vector<8x128xf32>
      %307 = math.exp %306 : vector<8x128xf32>
      %cst_98 = arith.constant dense<0.000000e+00> : vector<8xf32>
      %308 = vector.multi_reduction <add>, %307, %cst_98 [1] : vector<8x128xf32> to vector<8xf32>
      %309 = vector.shape_cast %308 : vector<8xf32> to vector<8x1xf32>
      %310 = tpu.reciprocal %309 : vector<8x1xf32> -> vector<8x1xf32>
      %311 = vector.broadcast %310 : vector<8x1xf32> to vector<8x128xf32>
      %312 = arith.mulf %307, %311 : vector<8x128xf32>
      %c0_99 = arith.constant 0 : index
      %c0_100 = arith.constant 0 : index
      %313 = vector.load %arg10[%c0_99, %c0_100] : memref<8x128xf32, #tpu.memory_space<vmem>>, vector<8x128xf32>
      tpu.vector_store %arg10[%c0_99, %c0_100], %312 {strides = array<i32>} : memref<8x128xf32, #tpu.memory_space<vmem>>, vector<8x128xf32>,
    } else {
    }
    return
  }
  func.func @transform_0(%arg0: i32, %arg1: i32) -> (i32, i32, i32) {
    %c0_i32 = arith.constant 0 : i32
    %c0_i32_0 = arith.constant 0 : i32
    return %arg1, %arg0, %c0_i32 : i32, i32, i32
  }
  func.func @transform_1(%arg0: i32, %arg1: i32) -> (i32, i32) {
    %c0_i32 = arith.constant 0 : i32
    %c0_i32_0 = arith.constant 0 : i32
    return %arg1, %c0_i32 : i32, i32
  }
  func.func @transform_2(%arg0: i32, %arg1: i32) -> (i32, i32) {
    %c0_i32 = arith.constant 0 : i32
    %c0_i32_0 = arith.constant 0 : i32
    %c0_i32_1 = arith.constant 0 : i32
    return %c0_i32, %c0_i32_0 : i32, i32
  }
  func.func @transform_3(%arg0: i32, %arg1: i32) -> (i32, i32) {
    %c0_i32 = arith.constant 0 : i32
    %c0_i32_0 = arith.constant 0 : i32
    %c0_i32_1 = arith.constant 0 : i32
    return %c0_i32, %c0_i32_0 : i32, i32
  }
  func.func @transform_4(%arg0: i32, %arg1: i32) -> (i32, i32) {
    %c0_i32 = arith.constant 0 : i32
    %c0_i32_0 = arith.constant 0 : i32
    %c0_i32_1 = arith.constant 0 : i32
    return %c0_i32, %c0_i32_0 : i32, i32
  }
  func.func @transform_5(%arg0: i32, %arg1: i32) -> (i32, i32) {
    %c0_i32 = arith.constant 0 : i32
    %c0_i32_0 = arith.constant 0 : i32
    %c0_i32_1 = arith.constant 0 : i32
    return %c0_i32, %c0_i32_0 : i32, i32
  }
  func.func @transform_6(%arg0: i32, %arg1: i32) -> (i32, i32) {
    %c0_i32 = arith.constant 0 : i32
    %c0_i32_0 = arith.constant 0 : i32
    %c0_i32_1 = arith.constant 0 : i32
    return %c0_i32, %c0_i32_0 : i32, i32
  }
  func.func @transform_7(%arg0: i32, %arg1: i32) -> (i32, i32) {
    %c0_i32 = arith.constant 0 : i32
    %c0_i32_0 = arith.constant 0 : i32
    %c0_i32_1 = arith.constant 0 : i32
    return %c0_i32, %c0_i32_0 : i32, i32
  }
  func.func @transform_8(%arg0: i32, %arg1: i32) -> (i32, i32) {
    %c0_i32 = arith.constant 0 : i32
    %c0_i32_0 = arith.constant 0 : i32
    return %arg0, %c0_i32 : i32, i32
  }
}

</mosaic_0001>

<bundles_post_ra>
// kernel: tpu_custom_call.1
= control target key start
LH: loop header
LB: loop body
LE: loop exit
PB: predicated region body
PF: predicated region fallthrough
CT: control target
= control target key end

     0   :  { %13 = vsyncpa [#allocation6], 0  ;;  %s3027_s0 = inlined_call_operand.vmem [shape: f32[8,8,4], index: 0, kind: input, shape index: {}]   ;;  %s3028_s1 = inlined_call_operand.vmem [shape: f32[8,512], index: 1, kind: input, shape index: {}]   ;;  %s3029_s2 = inlined_call_operand.hbm [shape: bf16[4,512], index: 2, kind: input, shape index: {}]   ;;  %s3030_s3 = inlined_call_operand.hbm [shape: bf16[128,512], index: 3, kind: input, shape index: {}]   ;;  %s3031_s4 = inlined_call_operand.vmem [shape: bf16[128,128], index: 4, kind: input, shape index: {}]   ;;  %s3032_s5 = inlined_call_operand.vmem [shape: f32[1,128], index: 5, kind: input, shape index: {}]   ;;  %s3033_s6 = inlined_call_operand.hbm [shape: bf16[128,128], index: 6, kind: input, shape index: {}]   ;;  %s3034_s7 = inlined_call_operand.vmem [shape: f32[1,128], index: 7, kind: input, shape index: {}]   ;;  %s3035_s8 = inlined_call_operand.hbm [shape: f32[8,128], index: 8, kind: output, shape index: {}]  }
   0x1   :  { %14 = vsyncpa [#allocation9], 0  ;;  %s35_s29 = sshll.u32 %s3030_s3, 4  ;;  %s36_s29 = int_to_ptr.hbm [resolvable:$true] %s35_s29 }
   0x2   :  { %15 = vsyncpa [#allocation7], 0  ;;  %s2373_s30 = smov [#allocation8]   ;;  %s25_s12 = sshll.u32 %s3029_s2, 4  ;;  %s26_s12 = int_to_ptr.hbm [resolvable:$true] %s25_s12 }
   0x3   :  { %s37_s9 = sshll.u32 %s2373_s30, 4  ;;  %s2374_s13 = smov 256   ;;  %s38_s9 = int_to_ptr.vmem [resolvable:$true] %s37_s9 }
   0x4   :  { %s2375_s14 = smov 16   ;;  %s2376_s15 = smov [#allocation5]  }
   0x5   :  { %43 = dma.hbm_to_vmem [thread:$0]  %s36_s29, 4096, %s38_s9, [#allocation9], %s2374_s13, %s2374_s13, %s2375_s14  }
   0x6   :  { %s27_s16 = sshll.u32 %s2376_s15, 4  ;;  %s52_s19 = sshll.u32 %s3033_s6, 4  ;;  %s28_s16 = int_to_ptr.vmem [resolvable:$true] %s27_s16  ;;  %s53_s19 = int_to_ptr.hbm [resolvable:$true] %s52_s19 }
   0x7   :  { %30 = dma.hbm_to_vmem [thread:$0]  %s26_s12, 128, %s28_s16, [#allocation6]  }
   0x8   :  { %s2377_s3 = smov [#allocation10]   ;;  %s2378_s21 = smov 64  }
   0x9   :  { %s54_s20 = sshll.u32 %s2377_s3, 4  ;;  %s2379_s22 = smov 4   ;;  %s55_s20 = int_to_ptr.vmem [resolvable:$true] %s54_s20 }
   0xa   :  { %60 = dma.hbm_to_vmem [thread:$0]  %s53_s19, 1024, %s55_s20, [#allocation9], %s2378_s21, %s2378_s21, %s2379_s22  }
   0xb   :  { %2367 = dma.done.wait [#allocation6], 128  }
   0xc   :  { %2368 = vsyncadd [#allocation6], 4294967168 }
   0xd   :  { %2369 = dma.done.wait [#allocation9], 5120  }
   0xe   :  { %2370 = vsyncadd [#allocation9], 4294962176  ;;  %v94_v0 = vld [vmem:[#allocation5] sm:$0xff]  ;;  %v82_v1 = vld [vmem:[%s3027_s0] sm:$0xff]  ;;  %vm114_vm0 = vcmask 1041408   ;;  %vm101_vm1 = vcmask 31744  }
   0xf   :  { %96 = vst [vmem:[#allocation1] ss:$4 sm:$0xff] %v94_v0  ;;  %v83_v2 = vld [vmem:[%s3027_s0 + $0x8] sm:$0xff]  ;;  %v88_v3 = vld [vmem:[%s3027_s0 + $0x30] sm:$0xff]  ;;  %v89_v4 = vld [vmem:[%s3027_s0 + $0x38] sm:$0xff]  ;;  %vm250_vm2 = vcmask 1040384  }
  0x10   :  { %v2107_v5 = vld [vmem:[#allocation8 + $0xec] sm:$0xf]  ;;  %v1986_v6 = vld [vmem:[#allocation8 + $0xf8] sm:$0xf0]  ;;  %v1976_v7 = vld [vmem:[#allocation8 + $0xe0] sm:$0xf]  ;;  %v2450_v16 = vpack.c.bf16 %v83_v2, %v82_v1  ;;  %v2452_v17 = vpack.c.bf16 %v89_v4, %v88_v3 }
  0x11   :  { %v2108_v8 = vld [vmem:[#allocation8 + $0xec] sm:$0xf0]  ;;  %v2106_v9 = vld [vmem:[#allocation8 + $0xe4] sm:$0xf]  ;;  %v1978_v10 = vld [vmem:[#allocation8 + $0xf0] sm:$0xf0]  ;;  %v2456_v23 = vor.u32 %v2107_v5, %v1986_v6 }
  0x12   :  { %v1984_v11 = vld [vmem:[#allocation8 + $0xe8] sm:$0xf]  ;;  %v2109_v21 = vld [vmem:[#allocation8 + $0xf4] sm:$0xf0]  ;;  %v2458_v24 = vor.u32 %v2108_v8, %v1976_v7  ;;  %v1960_v25 = vld [vmem:[#allocation8 + $0xc0] sm:$0xf]  ;;  %v2460_v26 = vor.u32 %v2106_v9, %v1978_v10 }
  0x13   :  { %v2104_v27 = vld [vmem:[#allocation8 + $0xcc] sm:$0xf0]  ;;  %v2103_v28 = vld [vmem:[#allocation8 + $0xcc] sm:$0xf]  ;;  %v1970_v29 = vld [vmem:[#allocation8 + $0xd8] sm:$0xf0]  ;;  %v2462_v30 = vor.u32 %v2109_v21, %v1984_v11 }
  0x14   :  { %v2102_v31 = vld [vmem:[#allocation8 + $0xc4] sm:$0xf]  ;;  %v1962_v32 = vld [vmem:[#allocation8 + $0xd0] sm:$0xf0]  ;;  %v1968_v33 = vld [vmem:[#allocation8 + $0xc8] sm:$0xf]  ;;  %v2474_v34 = vor.u32 %v2104_v27, %v1960_v25  ;;  %v2476_v35 = vor.u32 %v2103_v28, %v1970_v29 }
  0x15   :  { %v1944_v36 = vld [vmem:[#allocation8 + $0xa0] sm:$0xf]  ;;  %v2105_v37 = vld [vmem:[#allocation8 + $0xd4] sm:$0xf0]  ;;  %v2479_v38 = vor.u32 %v2102_v31, %v1962_v32  ;;  %v2100_v39 = vld [vmem:[#allocation8 + $0xac] sm:$0xf0] }
  0x16   :  { %v97_v12 = vld.sshfl [vmem:[#allocation1] sm:$0xff pattern:$0x73625140]  ;;  %v98_v13 = vld.sshfl [vmem:[#allocation1 + $0x8] sm:$0xff pattern:$0x73625140]  ;;  %v2482_v42 = vor.u32 %v2105_v37, %v1968_v33  ;;  %v2486_v46 = vor.u32 %v2100_v39, %v1944_v36 }
  0x17   :  { %v115_v14 = vsel %vm114_vm0, %v97_v12, 0  ;;  %v117_v15 = vsel %vm114_vm0, %v98_v13, 0  ;;  %v100_v18 = vld.sshfl [vmem:[#allocation1 + $0x18] sm:$0xff pattern:$0x73625140]  ;;  %v84_v57 = vld [vmem:[%s3027_s0 + $0x10] sm:$0xff] }
  0x18   :  { %130 = vmatpush.bf16.msra.mxu0 %v115_v14  ;;  %2126 = vmatpush.bf16.msra.mxu2 %v115_v14  ;;  %v121_v19 = vsel %vm114_vm0, %v100_v18, 0  ;;  %v99_v20 = vld.sshfl [vmem:[#allocation1 + $0x10] sm:$0xff pattern:$0x73625140]  ;;  %v2099_v40 = vld [vmem:[#allocation8 + $0xac] sm:$0xf] }
  0x19   :  { %159 = vmatpush.bf16.msra.mxu1 %v117_v15  ;;  %2127 = vmatpush.bf16.msra.mxu3 %v117_v15  ;;  %v119_v22 = vsel %vm114_vm0, %v99_v20, 0  ;;  %v1954_v41 = vld [vmem:[#allocation8 + $0xb8] sm:$0xf0]  ;;  %v2098_v43 = vld [vmem:[#allocation8 + $0xa4] sm:$0xf]  ;;  %v85_v58 = vld [vmem:[%s3027_s0 + $0x18] sm:$0xff] }
  0x1a   :  { %v1946_v44 = vld [vmem:[#allocation8 + $0xb0] sm:$0xf0]  ;;  %v1952_v45 = vld [vmem:[#allocation8 + $0xa8] sm:$0xf]  ;;  %v1928_v47 = vld [vmem:[#allocation8 + $0x80] sm:$0xf]  ;;  %v2488_v49 = vor.u32 %v2099_v40, %v1954_v41  ;;  %v91_v0 = vpack.c.bf16 %v85_v58, %v84_v57 }
  0x1b   :  { %1846 = vmatmul.msk.bf16.vlgmr.msra.gmra.mxu0 %vm101_vm1, %v2450_v16  ;;  %1849 = vmatmul.msk.bf16.vlgmr.msra.gmra.mxu2 %vm101_vm1, %v2452_v17  ;;  %v2096_v48 = vld [vmem:[#allocation8 + $0x8c] sm:$0xf0]  ;;  %v2101_v50 = vld [vmem:[#allocation8 + $0xb4] sm:$0xf0]  ;;  %v2491_v51 = vor.u32 %v2098_v43, %v1946_v44  ;;  %v2095_v52 = vld [vmem:[#allocation8 + $0x8c] sm:$0xf] }
  0x1c   :  { %188 = vmatpush.bf16.msrb.mxu2 %v119_v22  ;;  %1850 = vmatmul.msk.bf16.vlgmr.msra.gmra.mxu1 %vm101_vm1, %v2450_v16  ;;  %v1938_v53 = vld [vmem:[#allocation8 + $0x98] sm:$0xf0]  ;;  %v2494_v54 = vor.u32 %v2101_v50, %v1952_v45  ;;  %v2094_v55 = vld [vmem:[#allocation8 + $0x84] sm:$0xf]  ;;  %v1930_v56 = vld [vmem:[#allocation8 + $0x90] sm:$0xf0]  ;;  %v2503_v59 = vor.u32 %v2096_v48, %v1928_v47 }
  0x1d   :  { %217 = vmatpush.bf16.msrb.mxu3 %v121_v19  ;;  %625 = vmatpush.bf16.msrb.mxu0 %v2458_v24  ;;  %v2506_v60 = vor.u32 %v2095_v52, %v1938_v53  ;;  %v2509_v61 = vor.u32 %v2094_v55, %v1930_v56  ;;  %v1912_v62 = vld [vmem:[#allocation8 + $0x60] sm:$0xf]  ;;  %v2092_v63 = vld [vmem:[#allocation8 + $0x6c] sm:$0xf0]  ;;  %v2090_v1 = vld [vmem:[#allocation8 + $0x64] sm:$0xf] }
  0x1e   :  { %1853 = vmatmul.msk.bf16.vlgmr.msra.gmra.mxu3 %vm101_vm1, %v2452_v17  ;;  %638 = vmatpush.bf16.msrb.mxu1 %v2460_v26  ;;  %v1914_v2 = vld [vmem:[#allocation8 + $0x70] sm:$0xf0]  ;;  %v2513_v3 = vor.u32 %v2092_v63, %v1912_v62  ;;  %v1896_v5 = vld [vmem:[#allocation8 + $0x40] sm:$0xf]  ;;  %v2088_v6 = vld [vmem:[#allocation8 + $0x4c] sm:$0xf0] }
  0x1f   :  { %v2517_v4 = vor.u32 %v2090_v1, %v1914_v2  ;;  %v2086_v7 = vld [vmem:[#allocation8 + $0x44] sm:$0xf]  ;;  %v1898_v8 = vld [vmem:[#allocation8 + $0x50] sm:$0xf0]  ;;  %v1880_v9 = vld [vmem:[#allocation8 + $0x20] sm:$0xf]  ;;  %v2526_v13 = vor.u32 %v2088_v6, %v1896_v5 }
  0x20   :  { %651 = vmatpush.bf16.msra.mxu2 %v2462_v30  ;;  %v2091_v10 = vld [vmem:[#allocation8 + $0x6c] sm:$0xf]  ;;  %v1922_v11 = vld [vmem:[#allocation8 + $0x78] sm:$0xf0]  ;;  %v1936_v12 = vld [vmem:[#allocation8 + $0x88] sm:$0xf]  ;;  %v2531_v20 = vor.u32 %v2086_v7, %v1898_v8 }
  0x21   :  { %664 = vmatpush.bf16.msra.mxu3 %v2456_v23  ;;  %626 = vmatpush.bf16.msrb.mxu0 %v2474_v34  ;;  %v2528_v14 = vor.u32 %v2091_v10, %v1922_v11  ;;  %v2097_v15 = vld [vmem:[#allocation8 + $0x94] sm:$0xf0]  ;;  %v2087_v18 = vld [vmem:[#allocation8 + $0x4c] sm:$0xf]  ;;  %v1906_v19 = vld [vmem:[#allocation8 + $0x58] sm:$0xf0] }
  0x22   :  { %639 = vmatpush.bf16.msrb.mxu1 %v2479_v38  ;;  %v2084_v21 = vld [vmem:[#allocation8 + $0x2c] sm:$0xf0]  ;;  %v2533_v22 = vor.u32 %v2097_v15, %v1936_v12  ;;  %v2093_v25 = vld [vmem:[#allocation8 + $0x74] sm:$0xf0]  ;;  %v2082_v27 = vld [vmem:[#allocation8 + $0x24] sm:$0xf]  ;;  %v2536_v29 = vor.u32 %v2087_v18, %v1906_v19 }
  0x23   :  { %v1882_v28 = vld [vmem:[#allocation8 + $0x30] sm:$0xf0]  ;;  %v2542_v32 = vor.u32 %v2084_v21, %v1880_v9  ;;  %v1864_v36 = vld [vmem:[#allocation8] sm:$0xf]  ;;  %v2080_v37 = vld [vmem:[#allocation8 + $0xc] sm:$0xf0] }
  0x24   :  { %652 = vmatpush.bf16.msra.mxu2 %v2482_v42  ;;  %v2545_v33 = vor.u32 %v2082_v27, %v1882_v28  ;;  %v2078_v39 = vld [vmem:[#allocation8 + $0x4] sm:$0xf]  ;;  %v1866_v40 = vld [vmem:[#allocation8 + $0x10] sm:$0xf0]  ;;  %v87_v43 = vld [vmem:[%s3027_s0 + $0x28] sm:$0xff]  ;;  %v2556_v44 = vor.u32 %v2080_v37, %v1864_v36  ;;  %v2380_v7 = vmov 0.0|0.0  }
  0x25   :  { %665 = vmatpush.bf16.msra.mxu3 %v2476_v35  ;;  %627 = vmatpush.bf16.msrb.mxu0 %v2486_v46  ;;  %v86_v41 = vld [vmem:[%s3027_s0 + $0x20] sm:$0xff]  ;;  %v2559_v45 = vor.u32 %v2078_v39, %v1866_v40  ;;  %v2083_v48 = vld [vmem:[#allocation8 + $0x2c] sm:$0xf]  ;;  %v1890_v50 = vld [vmem:[#allocation8 + $0x38] sm:$0xf0]  ;;  %vm275_vm3 = vcmask 1046534  }
  0x26   :  { %640 = vmatpush.bf16.msrb.mxu1 %v2491_v51  ;;  %v92_v47 = vpack.c.bf16 %v87_v43, %v86_v41  ;;  %v1904_v52 = vld [vmem:[#allocation8 + $0x48] sm:$0xf]  ;;  %v2568_v53 = vor.u32 %v2083_v48, %v1890_v50  ;;  %v2089_v55 = vld [vmem:[#allocation8 + $0x54] sm:$0xf0]  ;;  %v2079_v56 = vld [vmem:[#allocation8 + $0xc] sm:$0xf] }
  0x27   :  { %v1874_v57 = vld [vmem:[#allocation8 + $0x18] sm:$0xf0]  ;;  %v2571_v58 = vor.u32 %v2089_v55, %v1904_v52  ;;  %v1888_v62 = vld [vmem:[#allocation8 + $0x28] sm:$0xf]  ;;  %v2085_v63 = vld [vmem:[#allocation8 + $0x34] sm:$0xf0] }
  0x28   :  { %653 = vmatpush.bf16.msra.mxu2 %v2494_v54  ;;  %v2575_v1 = vor.u32 %v2079_v56, %v1874_v57  ;;  %v1872_v2 = vld [vmem:[#allocation8 + $0x8] sm:$0xf]  ;;  %v2081_v5 = vld [vmem:[#allocation8 + $0x14] sm:$0xf0]  ;;  %v241_v8 = vld [vmem:[%s3028_s1 + $0x10] sm:$0xff]  ;;  %vm288_vm4 = vcmask 1045504  }
  0x29   :  { %666 = vmatpush.bf16.msra.mxu3 %v2488_v49  ;;  %628 = vmatpush.bf16.msrb.mxu0 %v2503_v59  ;;  %v2584_v6 = vor.u32 %v2081_v5, %v1872_v2  ;;  %v242_v9 = vld [vmem:[%s3028_s1 + $0x18] sm:$0xff]  ;;  %v2654_v10 = vld [vmem:[%s3028_s1] sm:$0xff]  ;;  %v2658_v12 = vrot.slane %v241_v8, 6  ;;  %vm255_vm5 = vcmask 1041409   ;;  %vm281_vm6 = vcmask 1046528   ;;  %s1835_s16 = sshll.u32 %s3035_s8, 4  ;;  %s1836_s16 = int_to_ptr.hbm [resolvable:$true] %s1835_s16 }
  0x2a   :  { %641 = vmatpush.bf16.msrb.mxu1 %v2509_v61  ;;  %3046 = vst [vmem:[#allocation15_spill] sm:$0xff] %v2575_v1  ;;  %v2660_v15 = vrot.slane %v242_v9, 5  ;;  %vm257_vm7 = vcmask 1043459   ;;  %vm259_vm8 = vcmask 1042433   ;;  %vm293_vm9 = vcmask 1046529  }
  0x2b   :  { %1847 = vmatmul.msk.bf16.gmra.mxu0 %vm101_vm1, %v91_v0  ;;  %1854 = vmatmul.msk.bf16.vlgmr.msrb.gmra.mxu2 %vm101_vm1, %v2450_v16  ;;  %vm252_vm10 = vcmask 1042434   ;;  %vm263_vm11 = vcmask 1044484   ;;  %vm265_vm12 = vcmask 1043458   ;;  %vm269_vm13 = vcmask 1045509  }
  0x2c   :  { %1851 = vmatmul.msk.bf16.gmra.mxu1 %vm101_vm1, %v91_v0  ;;  %654 = vmatpush.bf16.msra.mxu2 %v2533_v22  ;;  %v287_v19 = vsel %vm250_vm2, %v2658_v12, %v2660_v15  ;;  %v258_v27 = vsel %vm257_vm7, %v2658_v12, %v2660_v15  ;;  %v292_v28 = vsel %vm255_vm5, %v2658_v12, %v2660_v15  ;;  %vm271_vm14 = vcmask 1044483  }
  0x2d   :  { %667 = vmatpush.bf16.msra.mxu3 %v2506_v60  ;;  %629 = vmatpush.bf16.msrb.mxu0 %v2513_v3  ;;  %v264_v40 = vsel %vm263_vm11, %v2658_v12, %v2660_v15  ;;  %v270_v50 = vsel %vm269_vm13, %v2658_v12, %v2660_v15  ;;  %v276_v9 = vsel %vm275_vm3, %v2658_v12, %v2660_v15  ;;  %vm277_vm15 = vcmask 1045508  }
  0x2e   :  { %1858 = vmatmul.msk.bf16.vlgmr.msrb.gmra.mxu3 %vm101_vm1, %v2450_v16  ;;  %642 = vmatpush.bf16.msrb.mxu1 %v2517_v4  ;;  %v1920_v16 = vld [vmem:[#allocation8 + $0x68] sm:$0xf] }
  0x2f   :  { %v2539_v31 = vor.u32 %v2093_v25, %v1920_v16 }
  0x31   :  { %668 = vmatpush.bf16.msra.mxu3 %v2528_v14  ;;  %630 = vmatpush.bf16.msrb.mxu0 %v2526_v13 }
  0x32   :  { %643 = vmatpush.bf16.msrb.mxu1 %v2531_v20  ;;  %655 = vmatpush.bf16.msra.mxu2 %v2539_v31 }
  0x35   :  { %669 = vmatpush.bf16.msra.mxu3 %v2536_v29  ;;  %631 = vmatpush.bf16.msrb.mxu0 %v2542_v32 }
  0x36   :  { %644 = vmatpush.bf16.msrb.mxu1 %v2545_v33  ;;  %656 = vmatpush.bf16.msra.mxu2 %v2571_v58 }
  0x39   :  { %632 = vmatpush.bf16.msrb.mxu0 %v2556_v44  ;;  %670 = vmatpush.bf16.msra.mxu3 %v2568_v53 }
  0x3a   :  { %645 = vmatpush.bf16.msrb.mxu1 %v2559_v45 }
  0x3b   :  { %1848 = vmatmul.msk.bf16.gmra.mxu0 %vm101_vm1, %v92_v47  ;;  %1855 = vmatmul.msk.bf16.gmra.mxu2 %vm101_vm1, %v91_v0 }
  0x3c   :  { %1852 = vmatmul.msk.bf16.gmra.mxu1 %vm101_vm1, %v92_v47 }
  0x3d   :  { %752 = vmatpush.bf16.msra.mxu0 %v2458_v24  ;;  %671 = vmatpush.bf16.msra.mxu3 %v2575_v1 }
  0x3e   :  { %1859 = vmatmul.msk.bf16.gmra.mxu3 %vm101_vm1, %v91_v0  ;;  %765 = vmatpush.bf16.msra.mxu1 %v2460_v26  ;;  %v2578_v0 = vor.u32 %v2085_v63, %v1888_v62 }
  0x40   :  { %657 = vmatpush.bf16.msra.mxu2 %v2578_v0 }
  0x41   :  { %753 = vmatpush.bf16.msra.mxu0 %v2474_v34  ;;  %791 = vmatpush.bf16.msrb.mxu3 %v2456_v23 }
  0x42   :  { %766 = vmatpush.bf16.msra.mxu1 %v2479_v38 }
  0x44   :  { %658 = vmatpush.bf16.msra.mxu2 %v2584_v6 }
  0x45   :  { %754 = vmatpush.bf16.msra.mxu0 %v2486_v46  ;;  %792 = vmatpush.bf16.msrb.mxu3 %v2476_v35 }
  0x46   :  { %767 = vmatpush.bf16.msra.mxu1 %v2491_v51 }
  0x48   :  { %778 = vmatpush.bf16.msrb.mxu2 %v2462_v30 }
  0x49   :  { %755 = vmatpush.bf16.msra.mxu0 %v2503_v59  ;;  %793 = vmatpush.bf16.msrb.mxu3 %v2488_v49 }
  0x4a   :  { %768 = vmatpush.bf16.msra.mxu1 %v2509_v61 }
  0x4b   :  { %1856 = vmatmul.msk.bf16.gmra.mxu2 %vm101_vm1, %v92_v47  ;;  %633 = vmatmul.bf16.vlgmr.msrb.gmra.mxu0 %v2380_v7 }
  0x4c   :  { %646 = vmatmul.bf16.vlgmr.msrb.gmra.mxu1 %v2380_v7  ;;  %779 = vmatpush.bf16.msrb.mxu2 %v2482_v42 }
  0x4d   :  { %756 = vmatpush.bf16.msra.mxu0 %v2513_v3  ;;  %794 = vmatpush.bf16.msrb.mxu3 %v2506_v60 }
  0x4e   :  { %1860 = vmatmul.msk.bf16.gmra.mxu3 %vm101_vm1, %v92_v47  ;;  %769 = vmatpush.bf16.msra.mxu1 %v2517_v4  ;;  %v253_v47 = vsel %vm252_vm10, %v2658_v12, %v2660_v15 }
  0x50   :  { %780 = vmatpush.bf16.msrb.mxu2 %v2494_v54 }
  0x51   :  { %757 = vmatpush.bf16.msra.mxu0 %v2526_v13  ;;  %795 = vmatpush.bf16.msrb.mxu3 %v2528_v14 }
  0x52   :  { %770 = vmatpush.bf16.msra.mxu1 %v2531_v20 }
  0x54   :  { %781 = vmatpush.bf16.msrb.mxu2 %v2533_v22 }
  0x55   :  { %758 = vmatpush.bf16.msra.mxu0 %v2542_v32  ;;  %796 = vmatpush.bf16.msrb.mxu3 %v2536_v29 }
  0x56   :  { %771 = vmatpush.bf16.msra.mxu1 %v2545_v33 }
  0x58   :  { %782 = vmatpush.bf16.msrb.mxu2 %v2539_v31 }
  0x59   :  { %759 = vmatpush.bf16.msra.mxu0 %v2556_v44  ;;  %797 = vmatpush.bf16.msrb.mxu3 %v2568_v53 }
  0x5a   :  { %772 = vmatpush.bf16.msra.mxu1 %v2559_v45 }
  0x5b   :  { %1857 = vmatmul.msk.bf16.gmra.mxu2 %vm101_vm1, %v2452_v17 }
  0x5c   :  { %783 = vmatpush.bf16.msrb.mxu2 %v2571_v58 }
  0x5d   :  { %879 = vmatpush.bf16.msrb.mxu0 %v2458_v24  ;;  %798 = vmatpush.bf16.msrb.mxu3 %v2575_v1 }
  0x5e   :  { %892 = vmatpush.bf16.msrb.mxu1 %v2460_v26  ;;  %1861 = vmatmul.msk.bf16.gmra.mxu3 %vm101_vm1, %v2452_v17  ;;  %v240_v17 = vld [vmem:[%s3028_s1 + $0x8] sm:$0xff] }
  0x5f   :  { %v2656_v11 = vrot.slane %v240_v17, 7 }
  0x60   :  { %784 = vmatpush.bf16.msrb.mxu2 %v2578_v0 }
  0x61   :  { %880 = vmatpush.bf16.msrb.mxu0 %v2474_v34  ;;  %v286_v18 = vsel %vm275_vm3, %v2654_v10, %v2656_v11  ;;  %v256_v16 = vsel %vm255_vm5, %v2654_v10, %v2656_v11  ;;  %v291_v25 = vsel %vm281_vm6, %v2656_v11, %v2654_v10  ;;  %v262_v39 = vsel %vm252_vm10, %v2654_v10, %v2656_v11 }
  0x62   :  { %893 = vmatpush.bf16.msrb.mxu1 %v2479_v38  ;;  %v289_v21 = vsel %vm288_vm4, %v287_v19, %v286_v18  ;;  %v260_v36 = vsel %vm259_vm8, %v256_v16, %v258_v27  ;;  %v2684_v37 = vsel %vm293_vm9, %v292_v28, %v291_v25  ;;  %v266_v41 = vsel %vm265_vm12, %v262_v39, %v264_v40 }
  0x63   :  { %v251_v43 = vsel %vm250_vm2, %v2654_v10, %v2656_v11  ;;  %v268_v48 = vsel %vm257_vm7, %v2654_v10, %v2656_v11  ;;  %v2711_v62 = vrot.slane %v289_v21, 6  ;;  %v274_v8 = vsel %vm263_vm11, %v2654_v10, %v2656_v11 }
  0x64   :  { %785 = vmatpush.bf16.msrb.mxu2 %v2584_v6  ;;  %v2707_v52 = vsel %vm114_vm0, %v251_v43, %v253_v47  ;;  %v272_v55 = vsel %vm271_vm14, %v268_v48, %v270_v50  ;;  %v278_v19 = vsel %vm277_vm15, %v274_v8, %v276_v9  ;;  %vm283_vm0 = vcmask 1046533  }
  0x65   :  { %881 = vmatpush.bf16.msrb.mxu0 %v2486_v46  ;;  %v296_v56 = vperm.slane %v2707_v52, 0  ;;  %v297_v57 = vperm.slane %v2707_v52, 1  ;;  %v320_v18 = vperm.slane %v2711_v62, 0  ;;  %v321_v21 = vperm.slane %v2711_v62, 1 }
  0x66   :  { %894 = vmatpush.bf16.msrb.mxu1 %v2491_v51 }
  0x69   :  { %882 = vmatpush.bf16.msrb.mxu0 %v2503_v59 }
  0x6a   :  { %895 = vmatpush.bf16.msrb.mxu1 %v2509_v61 }
  0x6b   :  { %659 = vmatmul.bf16.vlgmr.msra.gmra.mxu2 %v2380_v7 }
  0x6c   :  { %905 = vmatpush.bf16.msra.mxu2 %v2462_v30 }
  0x6d   :  { %883 = vmatpush.bf16.msrb.mxu0 %v2513_v3 }
  0x6e   :  { %896 = vmatpush.bf16.msrb.mxu1 %v2517_v4  ;;  %672 = vmatmul.bf16.vlgmr.msra.gmra.mxu3 %v2380_v7  ;;  %v261_v7 = vrot.slane %v260_v36, 1 }
  0x6f   :  { %918 = vmatpush.bf16.msra.mxu3 %v2456_v23 }
  0x70   :  { %906 = vmatpush.bf16.msra.mxu2 %v2482_v42  ;;  %v300_v25 = vperm.slane %v261_v7, 0  ;;  %v301_v28 = vperm.slane %v261_v7, 1 }
  0x71   :  { %884 = vmatpush.bf16.msrb.mxu0 %v2526_v13 }
  0x72   :  { %897 = vmatpush.bf16.msrb.mxu1 %v2531_v20 }
  0x73   :  { %919 = vmatpush.bf16.msra.mxu3 %v2476_v35 }
  0x74   :  { %907 = vmatpush.bf16.msra.mxu2 %v2494_v54 }
  0x75   :  { %885 = vmatpush.bf16.msrb.mxu0 %v2542_v32 }
  0x76   :  { %898 = vmatpush.bf16.msrb.mxu1 %v2545_v33 }
  0x77   :  { %920 = vmatpush.bf16.msra.mxu3 %v2488_v49 }
  0x78   :  { %908 = vmatpush.bf16.msra.mxu2 %v2533_v22 }
  0x79   :  { %886 = vmatpush.bf16.msrb.mxu0 %v2556_v44 }
  0x7a   :  { %899 = vmatpush.bf16.msrb.mxu1 %v2559_v45 }
  0x7b   :  { %921 = vmatpush.bf16.msra.mxu3 %v2506_v60 }
  0x7c   :  { %909 = vmatpush.bf16.msra.mxu2 %v2539_v31 }
  0x7f   :  { %922 = vmatpush.bf16.msra.mxu3 %v2528_v14 }
  0x80   :  { %910 = vmatpush.bf16.msra.mxu2 %v2571_v58 }
  0x83   :  { %923 = vmatpush.bf16.msra.mxu3 %v2536_v29 }
  0x84   :  { %911 = vmatpush.bf16.msra.mxu2 %v2578_v0 }
  0x87   :  { %924 = vmatpush.bf16.msra.mxu3 %v2568_v53 }
  0x88   :  { %912 = vmatpush.bf16.msra.mxu2 %v2584_v6 }
  0x8b   :  { %925 = vmatpush.bf16.msra.mxu3 %v2575_v1 }
  0x98   :  { %v132_v63 = vpop.f32.mrf.mxu0 }
  0x99   :  { %v360_v2 = vadd.f32 %v296_v56, %v132_v63  ;;  %v161_v5 = vpop.f32.mrf.mxu1  ;;  %v282_v63 = vsel %vm281_vm6, %v2660_v15, %v2658_v12 }
  0x9a   :  { %v361_v17 = vadd.f32 %v297_v57, %v161_v5  ;;  %v280_v57 = vsel %vm269_vm13, %v2654_v10, %v2656_v11 }
  0x9c   :  { %v2720_v16 = vpack.c.bf16 %v361_v17, %v360_v2  ;;  %v267_v2 = vrot.slane %v266_v41, 2  ;;  %v284_v17 = vsel %vm283_vm0, %v280_v57, %v282_v63  ;;  %v279_v57 = vrot.slane %v278_v19, 4 }
  0x9e   :  { %v147_v27 = vpop.f32.mrf.mxu2  ;;  %v304_v8 = vperm.slane %v267_v2, 0  ;;  %v307_v19 = vperm.slane %v267_v2, 3 }
  0x9f   :  { %v384_v36 = vadd.f32 %v320_v18, %v147_v27  ;;  %v305_v18 = vperm.slane %v267_v2, 1 }
  0xa0   :  { %v134_v43 = vpop.f32.mrf.mxu0 }
  0xa1   :  { %v176_v39 = vpop.f32.mrf.mxu3  ;;  %v364_v47 = vadd.f32 %v300_v25, %v134_v43  ;;  %v163_v48 = vpop.f32.mrf.mxu1 }
  0xa2   :  { %v385_v40 = vadd.f32 %v321_v21, %v176_v39  ;;  %v365_v56 = vadd.f32 %v301_v28, %v163_v48 }
  0xa4   :  { %v2723_v50 = vpack.c.bf16 %v385_v40, %v384_v36  ;;  %v2731_v5 = vpack.c.bf16 %v365_v56, %v364_v47  ;;  %v273_v36 = vrot.slane %v272_v55, 3  ;;  %v302_v56 = vperm.slane %v261_v7, 2 }
  0xa6   :  { %3047 = vst [vmem:[#allocation16_spill] sm:$0xff] %v2723_v50  ;;  %v2733_v9 = vpop.f32.mrf.mxu2  ;;  %v308_v39 = vperm.slane %v273_v36, 0  ;;  %v309_v15 = vperm.slane %v273_v36, 1 }
  0xa7   :  { %3048 = vst [vmem:[#allocation17_spill] sm:$0xff] %v2731_v5 }
  0xa8   :  { %3049 = vst [vmem:[#allocation18_spill] sm:$0xff] %v2733_v9  ;;  %v137_v25 = vpop.f32.mrf.mxu0 }
  0xa9   :  { %v2735_v21 = vpop.f32.mrf.mxu3  ;;  %v368_v27 = vadd.f32 %v304_v8, %v137_v25  ;;  %v166_v28 = vpop.f32.mrf.mxu1  ;;  %v303_v8 = vperm.slane %v261_v7, 3  ;;  %v312_v25 = vperm.slane %v279_v57, 0 }
  0xaa   :  { %3050 = vst [vmem:[#allocation19_spill] sm:$0xff] %v2735_v21  ;;  %v369_v10 = vadd.f32 %v305_v18, %v166_v28  ;;  %v313_v18 = vperm.slane %v279_v57, 1 }
  0xac   :  { %v2737_v11 = vpack.c.bf16 %v369_v10, %v368_v27 }
  0xae   :  { %3051 = vst [vmem:[#allocation20_spill] sm:$0xff] %v2737_v11  ;;  %v2739_v12 = vpop.f32.mrf.mxu2  ;;  %v285_v11 = vrot.slane %v284_v17, 5  ;;  %v310_v17 = vperm.slane %v273_v36, 2 }
  0xb0   :  { %v139_v40 = vpop.f32.mrf.mxu0  ;;  %v317_v7 = vperm.slane %v285_v11, 1 }
  0xb1   :  { %v2741_v41 = vpop.f32.mrf.mxu3  ;;  %v372_v43 = vadd.f32 %v308_v39, %v139_v40  ;;  %v168_v47 = vpop.f32.mrf.mxu1  ;;  %v306_v40 = vperm.slane %v267_v2, 2 }
  0xb2   :  { %v373_v48 = vadd.f32 %v309_v15, %v168_v47 }
  0xb4   :  { %v2743_v63 = vpack.c.bf16 %v373_v48, %v372_v43  ;;  %v316_v43 = vperm.slane %v285_v11, 0 }
  0xb6   :  { %3052 = vst [vmem:[#allocation21_spill] sm:$0xff] %v2743_v63  ;;  %v192_v55 = vpop.f32.mrf.mxu2 }
  0xb7   :  { %v366_v27 = vadd.f32 %v302_v56, %v192_v55 }
  0xb8   :  { %v142_v21 = vpop.f32.mrf.mxu0 }
  0xb9   :  { %v221_v28 = vpop.f32.mrf.mxu3  ;;  %v376_v9 = vadd.f32 %v312_v25, %v142_v21  ;;  %v171_v50 = vpop.f32.mrf.mxu1 }
  0xba   :  { %v367_v10 = vadd.f32 %v303_v8, %v221_v28  ;;  %v377_v39 = vadd.f32 %v313_v18, %v171_v50  ;;  %v311_v50 = vperm.slane %v273_v36, 3 }
  0xbc   :  { %v2745_v5 = vpack.c.bf16 %v367_v10, %v366_v27  ;;  %v2747_v15 = vpack.c.bf16 %v377_v39, %v376_v9 }
  0xbe   :  { %3053 = vst [vmem:[#allocation22_spill] sm:$0xff] %v2747_v15  ;;  %v195_v47 = vpop.f32.mrf.mxu2 }
  0xbf   :  { %v370_v48 = vadd.f32 %v306_v40, %v195_v47  ;;  %v429_v40 = vunpack.c.h.bf16 %v2720_v16 }
  0xc0   :  { %v144_v56 = vpop.f32.mrf.mxu0 }
  0xc1   :  { %v224_v63 = vpop.f32.mrf.mxu3  ;;  %v380_v55 = vadd.f32 %v316_v43, %v144_v56  ;;  %v173_v8 = vpop.f32.mrf.mxu1  ;;  %v315_v43 = vperm.slane %v279_v57, 3 }
  0xc2   :  { %v371_v1 = vadd.f32 %v307_v19, %v224_v63  ;;  %v381_v21 = vadd.f32 %v317_v7, %v173_v8  ;;  %v428_v63 = vunpack.c.l.bf16 %v2720_v16  ;;  %v314_v19 = vperm.slane %v279_v57, 2 }
  0xc4   :  { %v2749_v28 = vpack.c.bf16 %v371_v1, %v370_v48  ;;  %v2751_v25 = vpack.c.bf16 %v381_v21, %v380_v55 }
  0xc6   :  { %v197_v18 = vpop.f32.mrf.mxu2 }
  0xc7   :  { %v374_v9 = vadd.f32 %v310_v17, %v197_v18  ;;  %v318_v18 = vperm.slane %v285_v11, 2 }
  0xc8   :  { %v634_v10 = vpop.f32.mrf.mxu0 }
  0xc9   :  { %v226_v27 = vpop.f32.mrf.mxu3  ;;  %v647_v39 = vpop.f32.mrf.mxu1  ;;  %v677_v1 = vadd.f32 %v634_v10, %v428_v63 }
  0xca   :  { %v375_v2 = vadd.f32 %v311_v50, %v226_v27  ;;  %v678_v47 = vadd.f32 %v647_v39, %v429_v40  ;;  %v322_v40 = vperm.slane %v2711_v62, 2 }
  0xcb   :  { %v1990_v36 = vmul.f32 -1.442695, %v677_v1 }
  0xcc   :  { %v2753_v15 = vpack.c.bf16 %v375_v2, %v374_v9  ;;  %v1991_v21 = vmul.f32 -1.442695, %v678_v47  ;;  %v319_v9 = vperm.slane %v285_v11, 3  ;;  %v2764_v11 = vrot.slane %v2684_v37, 7 }
  0xcd   :  { %2139 = vpow2.f32 %v1990_v36  ;;  %v298_v36 = vperm.slane %v2707_v52, 2 }
  0xce   :  { %v200_v7 = vpop.f32.mrf.mxu2  ;;  %2141 = vpow2.f32 %v1991_v21  ;;  %3054 = vst [vmem:[#allocation23_spill] sm:$0xff] %v2764_v11  ;;  %v326_v21 = vperm.slane %v2764_v11, 2 }
  0xcf   :  { %v378_v48 = vadd.f32 %v314_v19, %v200_v7  ;;  %v323_v19 = vperm.slane %v2711_v62, 3  ;;  %v327_v62 = vperm.slane %v2764_v11, 3 }
  0xd0   :  { %v636_v8 = vpop.f32.mrf.mxu0 }
  0xd1   :  { %v229_v56 = vpop.f32.mrf.mxu3  ;;  %v649_v17 = vpop.f32.mrf.mxu1 }
  0xd2   :  { %v379_v55 = vadd.f32 %v315_v43, %v229_v56  ;;  %v362_v17 = vadd.f32 %v298_v36, %v2739_v12 }
  0xd3   :  { %v2140_v57 = vpop.eup %2139 }
  0xd4   :  { %v2757_v50 = vpack.c.bf16 %v379_v55, %v378_v48  ;;  %v2142_v63 = vpop.eup %2141  ;;  %v684_v1 = vadd.f32 1.0, %v2140_v57  ;;  %v299_v55 = vperm.slane %v2707_v52, 3 }
  0xd5   :  { %v703_v43 = vadd.f32 1.0, %v2142_v63 }
  0xd6   :  { %v202_v27 = vpop.f32.mrf.mxu2  ;;  %2143 = vrcp.f32 %v684_v1  ;;  %vm690_vm3 = vweird.f32 %v684_v1 }
  0xd7   :  { %v382_v16 = vadd.f32 %v318_v18, %v202_v27  ;;  %2145 = vrcp.f32 %v703_v43  ;;  %v363_v18 = vadd.f32 %v299_v55, %v2741_v41  ;;  %vm709_vm4 = vweird.f32 %v703_v43 }
  0xd9   :  { %v231_v2 = vpop.f32.mrf.mxu3  ;;  %v393_v57 = vpack.c.bf16 %v363_v18, %v362_v17 }
  0xda   :  { %v383_v10 = vadd.f32 %v319_v9, %v231_v2 }
  0xdb   :  { %v430_v11 = vunpack.c.l.bf16 %v393_v57 }
  0xdc   :  { %v2759_v39 = vpack.c.bf16 %v383_v10, %v382_v16  ;;  %v2144_v27 = vpop.eup %2143 }
  0xdd   :  { %v2146_v2 = vpop.eup %2145  ;;  %v686_v52 = vmul.f32 %v2144_v27, %v684_v1  ;;  %vm691_vm1 = vweird.f32 %v2144_v27 }
  0xde   :  { %v205_v47 = vpop.f32.mrf.mxu2  ;;  %vm710_vm2 = vweird.f32 %v2146_v2  ;;  %vm692_vm5 = vmor %vm690_vm3, %vm691_vm1 }
  0xdf   :  { %v386_v7 = vadd.f32 %v322_v40, %v205_v47  ;;  %v705_v40 = vmul.f32 %v2146_v2, %v703_v43  ;;  %v431_v47 = vunpack.c.h.bf16 %v393_v57  ;;  %vm711_vm6 = vmor %vm709_vm4, %vm710_vm2 }
  0xe1   :  { %v234_v48 = vpop.f32.mrf.mxu3 }
  0xe2   :  { %v387_v56 = vadd.f32 %v323_v19, %v234_v48  ;;  %v706_v48 = vsub.f32 1.0, %v705_v40 }
  0xe4   :  { %v2768_v8 = vpack.c.bf16 %v387_v56, %v386_v7  ;;  %v687_v7 = vsub.f32 1.0, %v686_v52  ;;  %v707_v55 = vmul.f32 %v2146_v2, %v706_v48 }
  0xe6   :  { %3055 = vst [vmem:[#allocation24_spill] sm:$0xff] %v2768_v8  ;;  %v207_v9 = vpop.f32.mrf.mxu2  ;;  %v688_v8 = vmul.f32 %v2144_v27, %v687_v7  ;;  %v708_v17 = vadd.f32 %v2146_v2, %v707_v55 }
  0xe7   :  { %v390_v37 = vadd.f32 %v326_v21, %v207_v9  ;;  %v715_v9 = vand.u32 2147483648, %v703_v43 }
  0xe8   :  { %v712_v52 = vsel %vm711_vm6, %v2146_v2, %v708_v17 }
  0xe9   :  { %v236_v16 = vpop.f32.mrf.mxu3 }
  0xea   :  { %v391_v10 = vadd.f32 %v327_v62, %v236_v16  ;;  %v689_v62 = vadd.f32 %v2144_v27, %v688_v8  ;;  %v694_v16 = vand.u32 2147483647, %v684_v1 }
  0xec   :  { %v2774_v63 = vpack.c.bf16 %v391_v10, %v390_v37  ;;  %v696_v37 = vand.u32 2147483648, %v684_v1  ;;  %v713_v10 = vand.u32 2147483647, %v703_v43  ;;  %vm695_vm7 = vcmp.eq.f32.partialorder %v694_v16, 8.507059e+37 }
  0xee   :  { %v660_v19 = vpop.f32.mrf.mxu2  ;;  %v697_v7 = vor.u32 1.1754944e-38, %v696_v37  ;;  %vm714_vm8 = vcmp.eq.f32.partialorder %v713_v10, 8.507059e+37  ;;  %v3056_v10 = vld [vmem:[#allocation15_spill] sm:$0xff] }
  0xef   :  { %v679_v36 = vadd.f32 %v660_v19, %v430_v11  ;;  %v693_v11 = vsel %vm692_vm5, %v2144_v27, %v689_v62 }
  0xf0   :  { %v698_v8 = vsel %vm695_vm7, %v697_v7, %v693_v11 }
  0xf1   :  { %v673_v56 = vpop.f32.mrf.mxu3 }
  0xf2   :  { %v680_v12 = vadd.f32 %v673_v56, %v431_v47  ;;  %v716_v47 = vor.u32 1.1754944e-38, %v715_v9 }
  0xf4   :  { %v1992_v41 = vmul.f32 -1.442695, %v680_v12  ;;  %v717_v48 = vsel %vm714_vm8, %v716_v47, %v712_v52 }
  0xf5   :  { %v739_v12 = vmul.f32 0.0, %v717_v48 }
  0xf6   :  { %2147 = vpow2.f32 %v1992_v41  ;;  %v662_v21 = vpop.f32.mrf.mxu2 }
  0xf7   :  { %2149 = vtanh.f32 %v679_v36 }
  0xf9   :  { %v675_v18 = vpop.f32.mrf.mxu3 }
  0xfc   :  { %v2148_v57 = vpop.eup %2147 }
  0xfd   :  { %v723_v40 = vadd.f32 1.0, %v2148_v57  ;;  %v2150_v19 = vpop.eup %2149  ;;  %v3057_v57 = vld [vmem:[#allocation17_spill] sm:$0xff] }
  0xfe   :  { %v740_v56 = vmul.f32 %v2150_v19, %v698_v8  ;;  %v747_v11 = vunpack.c.l.bf16 %v3057_v57  ;;  %v748_v52 = vunpack.c.h.bf16 %v3057_v57 }
  0xff   :  { %2151 = vrcp.f32 %v723_v40  ;;  %v735_v27 = vand.u32 2147483648, %v723_v40  ;;  %v733_v55 = vand.u32 2147483647, %v723_v40  ;;  %vm729_vm10 = vweird.f32 %v723_v40 }
 0x100   :  { %v2776_v41 = vadd.f32 %v740_v56, %v739_v12  ;;  %v750_v56 = vunpack.c.h.bf16 %v2745_v5 }
 0x101   :  { %v736_v62 = vor.u32 1.1754944e-38, %v735_v27  ;;  %vm734_vm12 = vcmp.eq.f32.partialorder %v733_v55, 8.507059e+37 }
 0x102   :  { %2153 = vtanh.f32 %v2776_v41 }
 0x105   :  { %v2152_v36 = vpop.eup %2151 }
 0x106   :  { %v725_v1 = vmul.f32 %v2152_v36, %v723_v40  ;;  %vm730_vm9 = vweird.f32 %v2152_v36 }
 0x107   :  { %vm731_vm11 = vmor %vm729_vm10, %vm730_vm9 }
 0x108   :  { %v726_v43 = vsub.f32 1.0, %v725_v1  ;;  %v2154_v18 = vpop.eup %2153 }
 0x10a   :  { %v727_v2 = vmul.f32 %v2152_v36, %v726_v43 }
 0x10c   :  { %v728_v21 = vadd.f32 %v2152_v36, %v727_v2 }
 0x10e   :  { %v732_v17 = vsel %vm731_vm11, %v2152_v36, %v728_v21 }
 0x10f   :  { %v737_v9 = vsel %vm734_vm12, %v736_v62, %v732_v17 }
 0x110   :  { %v743_v37 = vmul.f32 %v2154_v18, %v737_v9 }
 0x112   :  { %v751_v16 = vpack.c.bf16 %v743_v37, %v743_v37 }
 0x114   :  { %760 = vmatmul.bf16.vlgmr.msra.gmra.mxu0 %v751_v16  ;;  %773 = vmatmul.bf16.vlgmr.msra.gmra.mxu1 %v751_v16 }
 0x115   :  { %786 = vmatmul.bf16.vlgmr.msrb.gmra.mxu2 %v751_v16  ;;  %799 = vmatmul.bf16.vlgmr.msrb.gmra.mxu3 %v751_v16  ;;  %v749_v16 = vunpack.c.l.bf16 %v2745_v5 }
 0x116   :  { %1006 = vmatpush.bf16.msra.mxu0 %v2458_v24  ;;  %1019 = vmatpush.bf16.msra.mxu1 %v2460_v26 }
 0x117   :  { %1032 = vmatpush.bf16.msrb.mxu2 %v2462_v30  ;;  %1045 = vmatpush.bf16.msrb.mxu3 %v2456_v23 }
 0x11a   :  { %1007 = vmatpush.bf16.msra.mxu0 %v2474_v34  ;;  %1020 = vmatpush.bf16.msra.mxu1 %v2479_v38 }
 0x11b   :  { %1033 = vmatpush.bf16.msrb.mxu2 %v2482_v42  ;;  %1046 = vmatpush.bf16.msrb.mxu3 %v2476_v35 }
 0x11e   :  { %1008 = vmatpush.bf16.msra.mxu0 %v2486_v46  ;;  %1021 = vmatpush.bf16.msra.mxu1 %v2491_v51 }
 0x11f   :  { %1034 = vmatpush.bf16.msrb.mxu2 %v2494_v54  ;;  %1047 = vmatpush.bf16.msrb.mxu3 %v2488_v49 }
 0x122   :  { %1009 = vmatpush.bf16.msra.mxu0 %v2503_v59  ;;  %1022 = vmatpush.bf16.msra.mxu1 %v2509_v61 }
 0x123   :  { %1035 = vmatpush.bf16.msrb.mxu2 %v2533_v22  ;;  %1048 = vmatpush.bf16.msrb.mxu3 %v2506_v60 }
 0x126   :  { %1010 = vmatpush.bf16.msra.mxu0 %v2513_v3  ;;  %1023 = vmatpush.bf16.msra.mxu1 %v2517_v4 }
 0x127   :  { %1036 = vmatpush.bf16.msrb.mxu2 %v2539_v31  ;;  %1049 = vmatpush.bf16.msrb.mxu3 %v2528_v14 }
 0x12a   :  { %1011 = vmatpush.bf16.msra.mxu0 %v2526_v13  ;;  %1024 = vmatpush.bf16.msra.mxu1 %v2531_v20 }
 0x12b   :  { %1037 = vmatpush.bf16.msrb.mxu2 %v2571_v58  ;;  %1050 = vmatpush.bf16.msrb.mxu3 %v2536_v29 }
 0x12e   :  { %1012 = vmatpush.bf16.msra.mxu0 %v2542_v32  ;;  %1025 = vmatpush.bf16.msra.mxu1 %v2545_v33 }
 0x12f   :  { %1038 = vmatpush.bf16.msrb.mxu2 %v2578_v0  ;;  %1051 = vmatpush.bf16.msrb.mxu3 %v2568_v53 }
 0x132   :  { %1013 = vmatpush.bf16.msra.mxu0 %v2556_v44  ;;  %1026 = vmatpush.bf16.msra.mxu1 %v2559_v45 }
 0x133   :  { %1039 = vmatpush.bf16.msrb.mxu2 %v2584_v6  ;;  %1052 = vmatpush.bf16.msrb.mxu3 %v3056_v10 }
 0x191   :  { %v761_v40 = vpop.f32.mrf.mxu0  ;;  %v774_v19 = vpop.f32.mrf.mxu1 }
 0x192   :  { %v804_v47 = vadd.f32 %v761_v40, %v747_v11  ;;  %v805_v7 = vadd.f32 %v774_v19, %v748_v52 }
 0x194   :  { %v1993_v8 = vmul.f32 -1.442695, %v804_v47  ;;  %v1994_v48 = vmul.f32 -1.442695, %v805_v7 }
 0x196   :  { %2155 = vpow2.f32 %v1993_v8 }
 0x197   :  { %2157 = vpow2.f32 %v1994_v48 }
 0x198   :  { %v787_v12 = vpop.f32.mrf.mxu2  ;;  %v800_v36 = vpop.f32.mrf.mxu3 }
 0x199   :  { %v807_v1 = vadd.f32 %v800_v36, %v750_v56  ;;  %v763_v43 = vpop.f32.mrf.mxu0  ;;  %v776_v27 = vpop.f32.mrf.mxu1  ;;  %v806_v52 = vadd.f32 %v787_v12, %v749_v16 }
 0x19b   :  { %v1995_v2 = vmul.f32 -1.442695, %v807_v1 }
 0x19c   :  { %v2156_v55 = vpop.eup %2155 }
 0x19d   :  { %v2158_v21 = vpop.eup %2157  ;;  %v811_v62 = vadd.f32 1.0, %v2156_v55  ;;  %2159 = vpow2.f32 %v1995_v2 }
 0x19e   :  { %v830_v17 = vadd.f32 1.0, %v2158_v21 }
 0x19f   :  { %2161 = vrcp.f32 %v811_v62  ;;  %v823_v48 = vand.u32 2147483648, %v811_v62  ;;  %v821_v1 = vand.u32 2147483647, %v811_v62  ;;  %vm817_vm15 = vweird.f32 %v811_v62 }
 0x1a0   :  { %2163 = vrcp.f32 %v830_v17  ;;  %v789_v18 = vpop.f32.mrf.mxu2  ;;  %v802_v9 = vpop.f32.mrf.mxu3  ;;  %v842_v56 = vand.u32 2147483648, %v830_v17  ;;  %v840_v27 = vand.u32 2147483647, %v830_v17  ;;  %vm836_vm0 = vweird.f32 %v830_v17 }
 0x1a1   :  { %v824_v12 = vor.u32 1.1754944e-38, %v823_v48  ;;  %vm822_vm3 = vcmp.eq.f32.partialorder %v821_v1, 8.507059e+37 }
 0x1a2   :  { %v843_v18 = vor.u32 1.1754944e-38, %v842_v56  ;;  %vm841_vm4 = vcmp.eq.f32.partialorder %v840_v27, 8.507059e+37 }
 0x1a3   :  { %v2160_v37 = vpop.eup %2159 }
 0x1a4   :  { %v850_v57 = vadd.f32 1.0, %v2160_v37 }
 0x1a5   :  { %v2162_v11 = vpop.eup %2161 }
 0x1a6   :  { %v2164_v40 = vpop.eup %2163  ;;  %v813_v19 = vmul.f32 %v2162_v11, %v811_v62  ;;  %2165 = vrcp.f32 %v850_v57  ;;  %vm818_vm13 = vweird.f32 %v2162_v11  ;;  %v862_v48 = vand.u32 2147483648, %v850_v57 }
 0x1a7   :  { %v832_v47 = vmul.f32 %v2164_v40, %v830_v17  ;;  %2167 = vtanh.f32 %v806_v52  ;;  %vm837_vm14 = vweird.f32 %v2164_v40  ;;  %vm819_vm1 = vmor %vm817_vm15, %vm818_vm13  ;;  %vm856_vm6 = vweird.f32 %v850_v57 }
 0x1a8   :  { %v814_v7 = vsub.f32 1.0, %v813_v19  ;;  %vm838_vm2 = vmor %vm836_vm0, %vm837_vm14  ;;  %v863_v1 = vor.u32 1.1754944e-38, %v862_v48 }
 0x1a9   :  { %v833_v8 = vsub.f32 1.0, %v832_v47 }
 0x1aa   :  { %v815_v36 = vmul.f32 %v2162_v11, %v814_v7 }
 0x1ab   :  { %v834_v43 = vmul.f32 %v2164_v40, %v833_v8 }
 0x1ac   :  { %v2166_v2 = vpop.eup %2165  ;;  %v816_v5 = vadd.f32 %v2162_v11, %v815_v36 }
 0x1ad   :  { %v835_v55 = vadd.f32 %v2164_v40, %v834_v43  ;;  %v852_v21 = vmul.f32 %v2166_v2, %v850_v57  ;;  %v2168_v37 = vpop.eup %2167  ;;  %vm857_vm5 = vweird.f32 %v2166_v2 }
 0x1ae   :  { %v820_v9 = vsel %vm819_vm1, %v2162_v11, %v816_v5  ;;  %v860_v11 = vand.u32 2147483647, %v850_v57  ;;  %vm858_vm7 = vmor %vm856_vm6, %vm857_vm5 }
 0x1af   :  { %v825_v16 = vsel %vm822_vm3, %v824_v12, %v820_v9  ;;  %v839_v52 = vsel %vm838_vm2, %v2164_v40, %v835_v55  ;;  %v853_v19 = vsub.f32 1.0, %v852_v21 }
 0x1b0   :  { %v844_v47 = vsel %vm841_vm4, %v843_v18, %v839_v52  ;;  %v867_v7 = vmul.f32 %v2168_v37, %v825_v16  ;;  %vm861_vm8 = vcmp.eq.f32.partialorder %v860_v11, 8.507059e+37  ;;  %v877_v16 = vunpack.c.h.bf16 %v2749_v28 }
 0x1b1   :  { %v866_v8 = vmul.f32 %v844_v47, %v2776_v41  ;;  %v854_v36 = vmul.f32 %v2166_v2, %v853_v19  ;;  %v3058_v41 = vld [vmem:[#allocation20_spill] sm:$0xff] }
 0x1b2   :  { %v874_v57 = vunpack.c.l.bf16 %v3058_v41 }
 0x1b3   :  { %v2816_v62 = vadd.f32 %v867_v7, %v866_v8  ;;  %v855_v17 = vadd.f32 %v2166_v2, %v854_v36 }
 0x1b5   :  { %2169 = vtanh.f32 %v2816_v62  ;;  %v859_v56 = vsel %vm858_vm7, %v2166_v2, %v855_v17  ;;  %v875_v2 = vunpack.c.h.bf16 %v3058_v41 }
 0x1b6   :  { %v864_v43 = vsel %vm861_vm8, %v863_v1, %v859_v56 }
 0x1bb   :  { %v2170_v40 = vpop.eup %2169 }
 0x1bc   :  { %v870_v27 = vmul.f32 %v2170_v40, %v864_v43 }
 0x1be   :  { %v878_v5 = vpack.c.bf16 %v870_v27, %v870_v27  ;;  %v876_v27 = vunpack.c.l.bf16 %v2749_v28 }
 0x1c0   :  { %887 = vmatmul.bf16.vlgmr.msrb.gmra.mxu0 %v878_v5  ;;  %900 = vmatmul.bf16.vlgmr.msrb.gmra.mxu1 %v878_v5 }
 0x1c1   :  { %913 = vmatmul.bf16.vlgmr.msra.gmra.mxu2 %v878_v5  ;;  %926 = vmatmul.bf16.vlgmr.msra.gmra.mxu3 %v878_v5 }
 0x1c2   :  { %1133 = vmatpush.bf16.msrb.mxu0 %v2458_v24  ;;  %1146 = vmatpush.bf16.msrb.mxu1 %v2460_v26 }
 0x1c3   :  { %1159 = vmatpush.bf16.msra.mxu2 %v2462_v30  ;;  %1172 = vmatpush.bf16.msra.mxu3 %v2456_v23 }
 0x1c6   :  { %1134 = vmatpush.bf16.msrb.mxu0 %v2474_v34  ;;  %1147 = vmatpush.bf16.msrb.mxu1 %v2479_v38 }
 0x1c7   :  { %1160 = vmatpush.bf16.msra.mxu2 %v2482_v42  ;;  %1173 = vmatpush.bf16.msra.mxu3 %v2476_v35 }
 0x1ca   :  { %1135 = vmatpush.bf16.msrb.mxu0 %v2486_v46  ;;  %1148 = vmatpush.bf16.msrb.mxu1 %v2491_v51 }
 0x1cb   :  { %1161 = vmatpush.bf16.msra.mxu2 %v2494_v54  ;;  %1174 = vmatpush.bf16.msra.mxu3 %v2488_v49 }
 0x1ce   :  { %1136 = vmatpush.bf16.msrb.mxu0 %v2503_v59  ;;  %1149 = vmatpush.bf16.msrb.mxu1 %v2509_v61 }
 0x1cf   :  { %1162 = vmatpush.bf16.msra.mxu2 %v2533_v22  ;;  %1175 = vmatpush.bf16.msra.mxu3 %v2506_v60 }
 0x1d2   :  { %1137 = vmatpush.bf16.msrb.mxu0 %v2513_v3  ;;  %1150 = vmatpush.bf16.msrb.mxu1 %v2517_v4 }
 0x1d3   :  { %1163 = vmatpush.bf16.msra.mxu2 %v2539_v31  ;;  %1176 = vmatpush.bf16.msra.mxu3 %v2528_v14 }
 0x1d6   :  { %1138 = vmatpush.bf16.msrb.mxu0 %v2526_v13  ;;  %1151 = vmatpush.bf16.msrb.mxu1 %v2531_v20 }
 0x1d7   :  { %1164 = vmatpush.bf16.msra.mxu2 %v2571_v58  ;;  %1177 = vmatpush.bf16.msra.mxu3 %v2536_v29 }
 0x1da   :  { %1139 = vmatpush.bf16.msrb.mxu0 %v2542_v32  ;;  %1152 = vmatpush.bf16.msrb.mxu1 %v2545_v33 }
 0x1db   :  { %1165 = vmatpush.bf16.msra.mxu2 %v2578_v0  ;;  %1178 = vmatpush.bf16.msra.mxu3 %v2568_v53 }
 0x1de   :  { %1140 = vmatpush.bf16.msrb.mxu0 %v2556_v44  ;;  %1153 = vmatpush.bf16.msrb.mxu1 %v2559_v45 }
 0x1df   :  { %1166 = vmatpush.bf16.msra.mxu2 %v2584_v6  ;;  %1179 = vmatpush.bf16.msra.mxu3 %v3056_v10 }
 0x23d   :  { %v888_v12 = vpop.f32.mrf.mxu0  ;;  %v901_v55 = vpop.f32.mrf.mxu1 }
 0x23e   :  { %v931_v21 = vadd.f32 %v888_v12, %v874_v57  ;;  %v932_v18 = vadd.f32 %v901_v55, %v875_v2 }
 0x240   :  { %v1996_v9 = vmul.f32 -1.442695, %v931_v21  ;;  %v1997_v37 = vmul.f32 -1.442695, %v932_v18 }
 0x242   :  { %2171 = vpow2.f32 %v1996_v9 }
 0x243   :  { %2173 = vpow2.f32 %v1997_v37 }
 0x244   :  { %v914_v52 = vpop.f32.mrf.mxu2  ;;  %v927_v19 = vpop.f32.mrf.mxu3 }
 0x245   :  { %v934_v47 = vadd.f32 %v927_v19, %v877_v16  ;;  %v890_v7 = vpop.f32.mrf.mxu0  ;;  %v903_v8 = vpop.f32.mrf.mxu1  ;;  %v933_v57 = vadd.f32 %v914_v52, %v876_v27 }
 0x247   :  { %v1998_v36 = vmul.f32 -1.442695, %v934_v47 }
 0x248   :  { %v2172_v17 = vpop.eup %2171 }
 0x249   :  { %v2174_v48 = vpop.eup %2173  ;;  %v938_v11 = vadd.f32 1.0, %v2172_v17  ;;  %2175 = vpow2.f32 %v1998_v36 }
 0x24a   :  { %v957_v56 = vadd.f32 1.0, %v2174_v48 }
 0x24b   :  { %2177 = vrcp.f32 %v938_v11  ;;  %v950_v9 = vand.u32 2147483648, %v938_v11  ;;  %v948_v19 = vand.u32 2147483647, %v938_v11  ;;  %vm944_vm11 = vweird.f32 %v938_v11 }
 0x24c   :  { %2179 = vrcp.f32 %v957_v56  ;;  %v916_v1 = vpop.f32.mrf.mxu2  ;;  %v929_v40 = vpop.f32.mrf.mxu3  ;;  %v969_v37 = vand.u32 2147483648, %v957_v56  ;;  %v967_v7 = vand.u32 2147483647, %v957_v56  ;;  %vm963_vm12 = vweird.f32 %v957_v56 }
 0x24d   :  { %v951_v52 = vor.u32 1.1754944e-38, %v950_v9  ;;  %vm949_vm15 = vcmp.eq.f32.partialorder %v948_v19, 8.507059e+37 }
 0x24e   :  { %v970_v48 = vor.u32 1.1754944e-38, %v969_v37  ;;  %vm968_vm0 = vcmp.eq.f32.partialorder %v967_v7, 8.507059e+37 }
 0x24f   :  { %v2176_v43 = vpop.eup %2175 }
 0x250   :  { %v977_v5 = vadd.f32 1.0, %v2176_v43 }
 0x251   :  { %v2178_v41 = vpop.eup %2177 }
 0x252   :  { %v2180_v2 = vpop.eup %2179  ;;  %v940_v12 = vmul.f32 %v2178_v41, %v938_v11  ;;  %2181 = vrcp.f32 %v977_v5  ;;  %vm945_vm9 = vweird.f32 %v2178_v41  ;;  %v989_v9 = vand.u32 2147483648, %v977_v5 }
 0x253   :  { %v959_v55 = vmul.f32 %v2180_v2, %v957_v56  ;;  %2183 = vtanh.f32 %v933_v57  ;;  %vm964_vm10 = vweird.f32 %v2180_v2  ;;  %vm946_vm13 = vmor %vm944_vm11, %vm945_vm9  ;;  %vm983_vm2 = vweird.f32 %v977_v5 }
 0x254   :  { %v941_v21 = vsub.f32 1.0, %v940_v12  ;;  %vm965_vm14 = vmor %vm963_vm12, %vm964_vm10 }
 0x255   :  { %v960_v18 = vsub.f32 1.0, %v959_v55 }
 0x256   :  { %v942_v16 = vmul.f32 %v2178_v41, %v941_v21 }
 0x257   :  { %v961_v47 = vmul.f32 %v2180_v2, %v960_v18 }
 0x258   :  { %v2182_v8 = vpop.eup %2181  ;;  %v943_v28 = vadd.f32 %v2178_v41, %v942_v16  ;;  %v990_v16 = vor.u32 1.1754944e-38, %v989_v9 }
 0x259   :  { %v962_v36 = vadd.f32 %v2180_v2, %v961_v47  ;;  %v979_v17 = vmul.f32 %v2182_v8, %v977_v5  ;;  %v2184_v40 = vpop.eup %2183  ;;  %vm984_vm1 = vweird.f32 %v2182_v8 }
 0x25a   :  { %v947_v1 = vsel %vm946_vm13, %v2178_v41, %v943_v28  ;;  %v987_v41 = vand.u32 2147483647, %v977_v5  ;;  %vm985_vm3 = vmor %vm983_vm2, %vm984_vm1 }
 0x25b   :  { %v952_v43 = vsel %vm949_vm15, %v951_v52, %v947_v1  ;;  %v966_v27 = vsel %vm965_vm14, %v2180_v2, %v962_v36  ;;  %v980_v57 = vsub.f32 1.0, %v979_v17 }
 0x25c   :  { %v971_v12 = vsel %vm968_vm0, %v970_v48, %v966_v27  ;;  %v994_v55 = vmul.f32 %v2184_v40, %v952_v43  ;;  %vm988_vm4 = vcmp.eq.f32.partialorder %v987_v41, 8.507059e+37  ;;  %v1004_v40 = vunpack.c.h.bf16 %v2753_v15 }
 0x25d   :  { %v993_v21 = vmul.f32 %v971_v12, %v2816_v62  ;;  %v981_v18 = vmul.f32 %v2182_v8, %v980_v57  ;;  %v3059_v62 = vld [vmem:[#allocation21_spill] sm:$0xff] }
 0x25e   :  { %v1001_v5 = vunpack.c.l.bf16 %v3059_v62 }
 0x25f   :  { %v2856_v11 = vadd.f32 %v994_v55, %v993_v21  ;;  %v982_v56 = vadd.f32 %v2182_v8, %v981_v18 }
 0x261   :  { %2185 = vtanh.f32 %v2856_v11  ;;  %v986_v37 = vsel %vm985_vm3, %v2182_v8, %v982_v56  ;;  %v1002_v8 = vunpack.c.h.bf16 %v3059_v62 }
 0x262   :  { %v991_v19 = vsel %vm988_vm4, %v990_v16, %v986_v37 }
 0x267   :  { %v2186_v2 = vpop.eup %2185 }
 0x268   :  { %v997_v47 = vmul.f32 %v2186_v2, %v991_v19  ;;  %v1003_v19 = vunpack.c.l.bf16 %v2753_v15 }
 0x26a   :  { %v1005_v7 = vpack.c.bf16 %v997_v47, %v997_v47 }
 0x26c   :  { %1014 = vmatmul.bf16.vlgmr.msra.gmra.mxu0 %v1005_v7  ;;  %1027 = vmatmul.bf16.vlgmr.msra.gmra.mxu1 %v1005_v7 }
 0x26d   :  { %1040 = vmatmul.bf16.vlgmr.msrb.gmra.mxu2 %v1005_v7  ;;  %1053 = vmatmul.bf16.vlgmr.msrb.gmra.mxu3 %v1005_v7 }
 0x26e   :  { %1260 = vmatpush.bf16.msra.mxu0 %v2458_v24  ;;  %1273 = vmatpush.bf16.msra.mxu1 %v2460_v26 }
 0x26f   :  { %1286 = vmatpush.bf16.msrb.mxu2 %v2462_v30  ;;  %1299 = vmatpush.bf16.msrb.mxu3 %v2456_v23 }
 0x272   :  { %1261 = vmatpush.bf16.msra.mxu0 %v2474_v34  ;;  %1274 = vmatpush.bf16.msra.mxu1 %v2479_v38 }
 0x273   :  { %1287 = vmatpush.bf16.msrb.mxu2 %v2482_v42  ;;  %1300 = vmatpush.bf16.msrb.mxu3 %v2476_v35 }
 0x276   :  { %1262 = vmatpush.bf16.msra.mxu0 %v2486_v46  ;;  %1275 = vmatpush.bf16.msra.mxu1 %v2491_v51 }
 0x277   :  { %1288 = vmatpush.bf16.msrb.mxu2 %v2494_v54  ;;  %1301 = vmatpush.bf16.msrb.mxu3 %v2488_v49 }
 0x27a   :  { %1263 = vmatpush.bf16.msra.mxu0 %v2503_v59  ;;  %1276 = vmatpush.bf16.msra.mxu1 %v2509_v61 }
 0x27b   :  { %1289 = vmatpush.bf16.msrb.mxu2 %v2533_v22  ;;  %1302 = vmatpush.bf16.msrb.mxu3 %v2506_v60 }
 0x27e   :  { %1264 = vmatpush.bf16.msra.mxu0 %v2513_v3  ;;  %1277 = vmatpush.bf16.msra.mxu1 %v2517_v4 }
 0x27f   :  { %1290 = vmatpush.bf16.msrb.mxu2 %v2539_v31  ;;  %1303 = vmatpush.bf16.msrb.mxu3 %v2528_v14 }
 0x282   :  { %1265 = vmatpush.bf16.msra.mxu0 %v2526_v13  ;;  %1278 = vmatpush.bf16.msra.mxu1 %v2531_v20 }
 0x283   :  { %1291 = vmatpush.bf16.msrb.mxu2 %v2571_v58  ;;  %1304 = vmatpush.bf16.msrb.mxu3 %v2536_v29 }
 0x286   :  { %1266 = vmatpush.bf16.msra.mxu0 %v2542_v32  ;;  %1279 = vmatpush.bf16.msra.mxu1 %v2545_v33 }
 0x287   :  { %1292 = vmatpush.bf16.msrb.mxu2 %v2578_v0  ;;  %1305 = vmatpush.bf16.msrb.mxu3 %v2568_v53 }
 0x28a   :  { %1267 = vmatpush.bf16.msra.mxu0 %v2556_v44  ;;  %1280 = vmatpush.bf16.msra.mxu1 %v2559_v45 }
 0x28b   :  { %1293 = vmatpush.bf16.msrb.mxu2 %v2584_v6  ;;  %1306 = vmatpush.bf16.msrb.mxu3 %v3056_v10 }
 0x2e9   :  { %v1015_v28 = vpop.f32.mrf.mxu0  ;;  %v1028_v52 = vpop.f32.mrf.mxu1 }
 0x2ea   :  { %v1058_v36 = vadd.f32 %v1015_v28, %v1001_v5  ;;  %v1059_v17 = vadd.f32 %v1028_v52, %v1002_v8 }
 0x2ec   :  { %v1999_v48 = vmul.f32 -1.442695, %v1058_v36  ;;  %v2000_v1 = vmul.f32 -1.442695, %v1059_v17 }
 0x2ee   :  { %2187 = vpow2.f32 %v1999_v48 }
 0x2ef   :  { %2189 = vpow2.f32 %v2000_v1 }
 0x2f0   :  { %v1041_v43 = vpop.f32.mrf.mxu2  ;;  %v1054_v27 = vpop.f32.mrf.mxu3 }
 0x2f1   :  { %v1061_v57 = vadd.f32 %v1054_v27, %v1004_v40  ;;  %v1017_v12 = vpop.f32.mrf.mxu0  ;;  %v1030_v55 = vpop.f32.mrf.mxu1  ;;  %v1060_v62 = vadd.f32 %v1041_v43, %v1003_v19 }
 0x2f3   :  { %v2001_v21 = vmul.f32 -1.442695, %v1061_v57 }
 0x2f4   :  { %v2188_v18 = vpop.eup %2187 }
 0x2f5   :  { %v2190_v56 = vpop.eup %2189  ;;  %v1065_v9 = vadd.f32 1.0, %v2188_v18  ;;  %2191 = vpow2.f32 %v2001_v21 }
 0x2f6   :  { %v1084_v41 = vadd.f32 1.0, %v2190_v56 }
 0x2f7   :  { %2193 = vrcp.f32 %v1065_v9  ;;  %v1077_v17 = vand.u32 2147483648, %v1065_v9  ;;  %v1075_v40 = vand.u32 2147483647, %v1065_v9  ;;  %vm1071_vm7 = vweird.f32 %v1065_v9 }
 0x2f8   :  { %2195 = vrcp.f32 %v1084_v41  ;;  %v1043_v37 = vpop.f32.mrf.mxu2  ;;  %v1056_v16 = vpop.f32.mrf.mxu3  ;;  %v1096_v48 = vand.u32 2147483648, %v1084_v41  ;;  %v1094_v57 = vand.u32 2147483647, %v1084_v41  ;;  %vm1090_vm8 = vweird.f32 %v1084_v41 }
 0x2f9   :  { %v1078_v43 = vor.u32 1.1754944e-38, %v1077_v17  ;;  %vm1076_vm11 = vcmp.eq.f32.partialorder %v1075_v40, 8.507059e+37 }
 0x2fa   :  { %v1097_v18 = vor.u32 1.1754944e-38, %v1096_v48  ;;  %vm1095_vm12 = vcmp.eq.f32.partialorder %v1094_v57, 8.507059e+37 }
 0x2fb   :  { %v2192_v2 = vpop.eup %2191 }
 0x2fc   :  { %v1104_v47 = vadd.f32 1.0, %v2192_v2 }
 0x2fd   :  { %v2194_v7 = vpop.eup %2193 }
 0x2fe   :  { %v2196_v5 = vpop.eup %2195  ;;  %v1067_v8 = vmul.f32 %v2194_v7, %v1065_v9  ;;  %2197 = vrcp.f32 %v1104_v47  ;;  %vm1072_vm5 = vweird.f32 %v2194_v7  ;;  %vm1110_vm14 = vweird.f32 %v1104_v47 }
 0x2ff   :  { %v1086_v28 = vmul.f32 %v2196_v5, %v1084_v41  ;;  %2199 = vtanh.f32 %v1060_v62  ;;  %vm1091_vm6 = vweird.f32 %v2196_v5  ;;  %vm1073_vm9 = vmor %vm1071_vm7, %vm1072_vm5 }
 0x300   :  { %v1068_v52 = vsub.f32 1.0, %v1067_v8  ;;  %vm1092_vm10 = vmor %vm1090_vm8, %vm1091_vm6 }
 0x301   :  { %v1087_v36 = vsub.f32 1.0, %v1086_v28 }
 0x302   :  { %v1069_v1 = vmul.f32 %v2194_v7, %v1068_v52 }
 0x303   :  { %v1088_v27 = vmul.f32 %v2196_v5, %v1087_v36  ;;  %v1116_v36 = vand.u32 2147483648, %v1104_v47 }
 0x304   :  { %v2198_v12 = vpop.eup %2197  ;;  %v1070_v15 = vadd.f32 %v2194_v7, %v1069_v1 }
 0x305   :  { %v1089_v55 = vadd.f32 %v2196_v5, %v1088_v27  ;;  %v1106_v21 = vmul.f32 %v2198_v12, %v1104_v47  ;;  %v2200_v37 = vpop.eup %2199  ;;  %vm1111_vm13 = vweird.f32 %v2198_v12  ;;  %v1117_v48 = vor.u32 1.1754944e-38, %v1116_v36 }
 0x306   :  { %v1074_v56 = vsel %vm1073_vm9, %v2194_v7, %v1070_v15  ;;  %v1114_v7 = vand.u32 2147483647, %v1104_v47  ;;  %vm1112_vm15 = vmor %vm1110_vm14, %vm1111_vm13 }
 0x307   :  { %v1079_v16 = vsel %vm1076_vm11, %v1078_v43, %v1074_v56  ;;  %v1093_v2 = vsel %vm1092_vm10, %v2196_v5, %v1089_v55  ;;  %v1107_v19 = vsub.f32 1.0, %v1106_v21  ;;  %v1131_v56 = vunpack.c.h.bf16 %v2757_v50 }
 0x308   :  { %v1098_v62 = vsel %vm1095_vm12, %v1097_v18, %v1093_v2  ;;  %v1121_v8 = vmul.f32 %v2200_v37, %v1079_v16  ;;  %vm1115_vm0 = vcmp.eq.f32.partialorder %v1114_v7, 8.507059e+37 }
 0x309   :  { %v1120_v28 = vmul.f32 %v1098_v62, %v2856_v11  ;;  %v1108_v52 = vmul.f32 %v2198_v12, %v1107_v19  ;;  %v3060_v11 = vld [vmem:[#allocation22_spill] sm:$0xff] }
 0x30a   :  { %v1128_v47 = vunpack.c.l.bf16 %v3060_v11  ;;  %v1129_v57 = vunpack.c.h.bf16 %v3060_v11 }
 0x30b   :  { %v2896_v9 = vadd.f32 %v1121_v8, %v1120_v28  ;;  %v1109_v41 = vadd.f32 %v2198_v12, %v1108_v52 }
 0x30d   :  { %2201 = vtanh.f32 %v2896_v9  ;;  %v1113_v17 = vsel %vm1112_vm15, %v2198_v12, %v1109_v41 }
 0x30e   :  { %v1118_v1 = vsel %vm1115_vm0, %v1117_v48, %v1113_v17 }
 0x313   :  { %v2202_v5 = vpop.eup %2201 }
 0x314   :  { %v1124_v40 = vmul.f32 %v2202_v5, %v1118_v1  ;;  %v1130_v5 = vunpack.c.l.bf16 %v2757_v50 }
 0x316   :  { %v1132_v27 = vpack.c.bf16 %v1124_v40, %v1124_v40 }
 0x318   :  { %1141 = vmatmul.bf16.vlgmr.msrb.gmra.mxu0 %v1132_v27  ;;  %1154 = vmatmul.bf16.vlgmr.msrb.gmra.mxu1 %v1132_v27 }
 0x319   :  { %1167 = vmatmul.bf16.vlgmr.msra.gmra.mxu2 %v1132_v27  ;;  %1180 = vmatmul.bf16.vlgmr.msra.gmra.mxu3 %v1132_v27 }
 0x31a   :  { %1387 = vmatpush.bf16.msrb.mxu0 %v2458_v24  ;;  %1400 = vmatpush.bf16.msrb.mxu1 %v2460_v26 }
 0x31b   :  { %1413 = vmatpush.bf16.msra.mxu2 %v2462_v30  ;;  %1426 = vmatpush.bf16.msra.mxu3 %v2456_v23 }
 0x31e   :  { %1388 = vmatpush.bf16.msrb.mxu0 %v2474_v34  ;;  %1401 = vmatpush.bf16.msrb.mxu1 %v2479_v38 }
 0x31f   :  { %1414 = vmatpush.bf16.msra.mxu2 %v2482_v42  ;;  %1427 = vmatpush.bf16.msra.mxu3 %v2476_v35 }
 0x322   :  { %1389 = vmatpush.bf16.msrb.mxu0 %v2486_v46  ;;  %1402 = vmatpush.bf16.msrb.mxu1 %v2491_v51 }
 0x323   :  { %1415 = vmatpush.bf16.msra.mxu2 %v2494_v54  ;;  %1428 = vmatpush.bf16.msra.mxu3 %v2488_v49 }
 0x326   :  { %1390 = vmatpush.bf16.msrb.mxu0 %v2503_v59  ;;  %1403 = vmatpush.bf16.msrb.mxu1 %v2509_v61 }
 0x327   :  { %1416 = vmatpush.bf16.msra.mxu2 %v2533_v22  ;;  %1429 = vmatpush.bf16.msra.mxu3 %v2506_v60 }
 0x32a   :  { %1391 = vmatpush.bf16.msrb.mxu0 %v2513_v3  ;;  %1404 = vmatpush.bf16.msrb.mxu1 %v2517_v4 }
 0x32b   :  { %1417 = vmatpush.bf16.msra.mxu2 %v2539_v31  ;;  %1430 = vmatpush.bf16.msra.mxu3 %v2528_v14 }
 0x32e   :  { %1392 = vmatpush.bf16.msrb.mxu0 %v2526_v13  ;;  %1405 = vmatpush.bf16.msrb.mxu1 %v2531_v20 }
 0x32f   :  { %1418 = vmatpush.bf16.msra.mxu2 %v2571_v58  ;;  %1431 = vmatpush.bf16.msra.mxu3 %v2536_v29 }
 0x332   :  { %1393 = vmatpush.bf16.msrb.mxu0 %v2542_v32  ;;  %1406 = vmatpush.bf16.msrb.mxu1 %v2545_v33 }
 0x333   :  { %1419 = vmatpush.bf16.msra.mxu2 %v2578_v0  ;;  %1432 = vmatpush.bf16.msra.mxu3 %v2568_v53 }
 0x336   :  { %1394 = vmatpush.bf16.msrb.mxu0 %v2556_v44  ;;  %1407 = vmatpush.bf16.msrb.mxu1 %v2559_v45 }
 0x337   :  { %1420 = vmatpush.bf16.msra.mxu2 %v2584_v6  ;;  %1433 = vmatpush.bf16.msra.mxu3 %v3056_v10 }
 0x395   :  { %v1142_v12 = vpop.f32.mrf.mxu0  ;;  %v1155_v15 = vpop.f32.mrf.mxu1 }
 0x396   :  { %v1185_v43 = vadd.f32 %v1142_v12, %v1128_v47  ;;  %v1186_v55 = vadd.f32 %v1155_v15, %v1129_v57 }
 0x398   :  { %v2002_v21 = vmul.f32 -1.442695, %v1185_v43  ;;  %v2003_v18 = vmul.f32 -1.442695, %v1186_v55 }
 0x39a   :  { %2203 = vpow2.f32 %v2002_v21 }
 0x39b   :  { %2205 = vpow2.f32 %v2003_v18 }
 0x39c   :  { %v1168_v37 = vpop.f32.mrf.mxu2  ;;  %v1181_v16 = vpop.f32.mrf.mxu3 }
 0x39d   :  { %v1188_v2 = vadd.f32 %v1181_v16, %v1131_v56  ;;  %v1144_v19 = vpop.f32.mrf.mxu0  ;;  %v1157_v62 = vpop.f32.mrf.mxu1  ;;  %v1187_v27 = vadd.f32 %v1168_v37, %v1130_v5 }
 0x39f   :  { %v2004_v8 = vmul.f32 -1.442695, %v1188_v2 }
 0x3a0   :  { %v2204_v28 = vpop.eup %2203 }
 0x3a1   :  { %v2206_v52 = vpop.eup %2205  ;;  %v1192_v41 = vadd.f32 1.0, %v2204_v28  ;;  %2207 = vpow2.f32 %v2004_v8 }
 0x3a2   :  { %v1211_v36 = vadd.f32 1.0, %v2206_v52 }
 0x3a3   :  { %2209 = vrcp.f32 %v1192_v41  ;;  %v1204_v43 = vand.u32 2147483648, %v1192_v41  ;;  %v1202_v18 = vand.u32 2147483647, %v1192_v41  ;;  %vm1198_vm3 = vweird.f32 %v1192_v41 }
 0x3a4   :  { %2211 = vrcp.f32 %v1211_v36  ;;  %v1170_v7 = vpop.f32.mrf.mxu2  ;;  %v1183_v17 = vpop.f32.mrf.mxu3  ;;  %v1223_v55 = vand.u32 2147483648, %v1211_v36  ;;  %v1221_v16 = vand.u32 2147483647, %v1211_v36  ;;  %vm1217_vm4 = vweird.f32 %v1211_v36 }
 0x3a5   :  { %v1205_v37 = vor.u32 1.1754944e-38, %v1204_v43  ;;  %vm1203_vm7 = vcmp.eq.f32.partialorder %v1202_v18, 8.507059e+37 }
 0x3a6   :  { %v1224_v8 = vor.u32 1.1754944e-38, %v1223_v55  ;;  %vm1222_vm8 = vcmp.eq.f32.partialorder %v1221_v16, 8.507059e+37 }
 0x3a7   :  { %v2208_v48 = vpop.eup %2207 }
 0x3a8   :  { %v1231_v1 = vadd.f32 1.0, %v2208_v48 }
 0x3a9   :  { %v2210_v40 = vpop.eup %2209 }
 0x3aa   :  { %v2212_v11 = vpop.eup %2211  ;;  %v1194_v47 = vmul.f32 %v2210_v40, %v1192_v41  ;;  %2213 = vrcp.f32 %v1231_v1  ;;  %vm1199_vm1 = vweird.f32 %v2210_v40  ;;  %vm1237_vm10 = vweird.f32 %v1231_v1 }
 0x3ab   :  { %v1213_v57 = vmul.f32 %v2212_v11, %v1211_v36  ;;  %2215 = vtanh.f32 %v1187_v27  ;;  %vm1218_vm2 = vweird.f32 %v2212_v11  ;;  %vm1200_vm5 = vmor %vm1198_vm3, %vm1199_vm1 }
 0x3ac   :  { %v1195_v12 = vsub.f32 1.0, %v1194_v47  ;;  %vm1219_vm6 = vmor %vm1217_vm4, %vm1218_vm2 }
 0x3ad   :  { %v1214_v15 = vsub.f32 1.0, %v1213_v57 }
 0x3ae   :  { %v1196_v21 = vmul.f32 %v2210_v40, %v1195_v12  ;;  %v1243_v12 = vand.u32 2147483648, %v1231_v1 }
 0x3af   :  { %v1215_v56 = vmul.f32 %v2212_v11, %v1214_v15 }
 0x3b0   :  { %v2214_v2 = vpop.eup %2213  ;;  %v1197_v50 = vadd.f32 %v2210_v40, %v1196_v21  ;;  %v1244_v43 = vor.u32 1.1754944e-38, %v1243_v12 }
 0x3b1   :  { %v1216_v19 = vadd.f32 %v2212_v11, %v1215_v56  ;;  %v1233_v62 = vmul.f32 %v2214_v2, %v1231_v1  ;;  %v2216_v52 = vpop.eup %2215  ;;  %vm1238_vm9 = vweird.f32 %v2214_v2 }
 0x3b2   :  { %v1201_v28 = vsel %vm1200_vm5, %v2210_v40, %v1197_v50  ;;  %v1241_v40 = vand.u32 2147483647, %v1231_v1  ;;  %vm1239_vm11 = vmor %vm1237_vm10, %vm1238_vm9 }
 0x3b3   :  { %v1206_v7 = vsel %vm1203_vm7, %v1205_v37, %v1201_v28  ;;  %v1220_v17 = vsel %vm1219_vm6, %v2212_v11, %v1216_v19  ;;  %v1234_v48 = vsub.f32 1.0, %v1233_v62 }
 0x3b4   :  { %v1225_v5 = vsel %vm1222_vm8, %v1224_v8, %v1220_v17  ;;  %v1248_v27 = vmul.f32 %v2216_v52, %v1206_v7  ;;  %vm1242_vm12 = vcmp.eq.f32.partialorder %v1241_v40, 8.507059e+37 }
 0x3b5   :  { %v1247_v47 = vmul.f32 %v1225_v5, %v2896_v9  ;;  %v1235_v57 = vmul.f32 %v2214_v2, %v1234_v48 }
 0x3b7   :  { %v2936_v41 = vadd.f32 %v1248_v27, %v1247_v47  ;;  %v1236_v36 = vadd.f32 %v2214_v2, %v1235_v57 }
 0x3b9   :  { %2217 = vtanh.f32 %v2936_v41  ;;  %v1240_v15 = vsel %vm1239_vm11, %v2214_v2, %v1236_v36 }
 0x3ba   :  { %v1245_v55 = vsel %vm1242_vm12, %v1244_v43, %v1240_v15 }
 0x3bf   :  { %v2218_v11 = vpop.eup %2217 }
 0x3c0   :  { %v1251_v21 = vmul.f32 %v2218_v11, %v1245_v55 }
 0x3c2   :  { %v1259_v18 = vpack.c.bf16 %v1251_v21, %v1251_v21 }
 0x3c4   :  { %1268 = vmatmul.bf16.vlgmr.msra.gmra.mxu0 %v1259_v18  ;;  %1281 = vmatmul.bf16.vlgmr.msra.gmra.mxu1 %v1259_v18 }
 0x3c5   :  { %1294 = vmatmul.bf16.vlgmr.msrb.gmra.mxu2 %v1259_v18  ;;  %1307 = vmatmul.bf16.vlgmr.msrb.gmra.mxu3 %v1259_v18 }
 0x3c6   :  { %1514 = vmatpush.bf16.msra.mxu0 %v2458_v24  ;;  %1527 = vmatpush.bf16.msra.mxu1 %v2460_v26  ;;  %v1256_v24 = vunpack.c.h.bf16 %v2751_v25 }
 0x3c7   :  { %1540 = vmatpush.bf16.msrb.mxu2 %v2462_v30  ;;  %1553 = vmatpush.bf16.msrb.mxu3 %v2456_v23  ;;  %v1255_v23 = vunpack.c.l.bf16 %v2751_v25 }
 0x3ca   :  { %1515 = vmatpush.bf16.msra.mxu0 %v2474_v34  ;;  %1528 = vmatpush.bf16.msra.mxu1 %v2479_v38 }
 0x3cb   :  { %1541 = vmatpush.bf16.msrb.mxu2 %v2482_v42  ;;  %1554 = vmatpush.bf16.msrb.mxu3 %v2476_v35 }
 0x3ce   :  { %1516 = vmatpush.bf16.msra.mxu0 %v2486_v46  ;;  %1529 = vmatpush.bf16.msra.mxu1 %v2491_v51  ;;  %v1258_v46 = vunpack.c.h.bf16 %v2759_v39 }
 0x3cf   :  { %1542 = vmatpush.bf16.msrb.mxu2 %v2494_v54  ;;  %1555 = vmatpush.bf16.msrb.mxu3 %v2488_v49 }
 0x3d2   :  { %1517 = vmatpush.bf16.msra.mxu0 %v2503_v59  ;;  %1530 = vmatpush.bf16.msra.mxu1 %v2509_v61 }
 0x3d3   :  { %1543 = vmatpush.bf16.msrb.mxu2 %v2533_v22  ;;  %1556 = vmatpush.bf16.msrb.mxu3 %v2506_v60 }
 0x3d6   :  { %1518 = vmatpush.bf16.msra.mxu0 %v2513_v3  ;;  %1531 = vmatpush.bf16.msra.mxu1 %v2517_v4 }
 0x3d7   :  { %1544 = vmatpush.bf16.msrb.mxu2 %v2539_v31  ;;  %1557 = vmatpush.bf16.msrb.mxu3 %v2528_v14  ;;  %v1257_v31 = vunpack.c.l.bf16 %v2759_v39 }
 0x3da   :  { %1519 = vmatpush.bf16.msra.mxu0 %v2526_v13  ;;  %1532 = vmatpush.bf16.msra.mxu1 %v2531_v20 }
 0x3db   :  { %1545 = vmatpush.bf16.msrb.mxu2 %v2571_v58  ;;  %1558 = vmatpush.bf16.msrb.mxu3 %v2536_v29 }
 0x3de   :  { %1520 = vmatpush.bf16.msra.mxu0 %v2542_v32  ;;  %1533 = vmatpush.bf16.msra.mxu1 %v2545_v33 }
 0x3df   :  { %1546 = vmatpush.bf16.msrb.mxu2 %v2578_v0  ;;  %1559 = vmatpush.bf16.msrb.mxu3 %v2568_v53 }
 0x3e2   :  { %1521 = vmatpush.bf16.msra.mxu0 %v2556_v44  ;;  %1534 = vmatpush.bf16.msra.mxu1 %v2559_v45 }
 0x3e3   :  { %1547 = vmatpush.bf16.msrb.mxu2 %v2584_v6  ;;  %1560 = vmatpush.bf16.msrb.mxu3 %v3056_v10 }
 0x441   :  { %v1269_v26 = vpop.f32.mrf.mxu0  ;;  %v1282_v30 = vpop.f32.mrf.mxu1 }
 0x442   :  { %v1312_v34 = vadd.f32 %v1269_v26, %v1255_v23  ;;  %v1313_v35 = vadd.f32 %v1282_v30, %v1256_v24 }
 0x444   :  { %v2005_v38 = vmul.f32 -1.442695, %v1312_v34  ;;  %v2006_v42 = vmul.f32 -1.442695, %v1313_v35 }
 0x446   :  { %2219 = vpow2.f32 %v2005_v38 }
 0x447   :  { %2221 = vpow2.f32 %v2006_v42 }
 0x448   :  { %v1295_v49 = vpop.f32.mrf.mxu2  ;;  %v1308_v51 = vpop.f32.mrf.mxu3 }
 0x449   :  { %v1315_v54 = vadd.f32 %v1308_v51, %v1258_v46  ;;  %v1271_v59 = vpop.f32.mrf.mxu0  ;;  %v1284_v60 = vpop.f32.mrf.mxu1  ;;  %v1314_v44 = vadd.f32 %v1295_v49, %v1257_v31  ;;  %v3062_v46 = vld [vmem:[#allocation24_spill] sm:$0xff] }
 0x44a   :  { %v1385_v49 = vunpack.c.h.bf16 %v3062_v46 }
 0x44b   :  { %v2007_v61 = vmul.f32 -1.442695, %v1315_v54 }
 0x44c   :  { %v2220_v3 = vpop.eup %2219 }
 0x44d   :  { %v2222_v4 = vpop.eup %2221  ;;  %v1319_v13 = vadd.f32 1.0, %v2220_v3  ;;  %2223 = vpow2.f32 %v2007_v61 }
 0x44e   :  { %v1338_v14 = vadd.f32 1.0, %v2222_v4 }
 0x44f   :  { %2225 = vrcp.f32 %v1319_v13  ;;  %v1331_v25 = vand.u32 2147483648, %v1319_v13  ;;  %v1329_v1 = vand.u32 2147483647, %v1319_v13  ;;  %vm1325_vm15 = vweird.f32 %v1319_v13 }
 0x450   :  { %2227 = vrcp.f32 %v1338_v14  ;;  %v1297_v20 = vpop.f32.mrf.mxu2  ;;  %v1310_v22 = vpop.f32.mrf.mxu3  ;;  %v1350_v10 = vand.u32 2147483648, %v1338_v14  ;;  %v1348_v16 = vand.u32 2147483647, %v1338_v14  ;;  %vm1344_vm0 = vweird.f32 %v1338_v14 }
 0x451   :  { %v1332_v50 = vor.u32 1.1754944e-38, %v1331_v25  ;;  %vm1330_vm3 = vcmp.eq.f32.partialorder %v1329_v1, 8.507059e+37 }
 0x452   :  { %v1351_v62 = vor.u32 1.1754944e-38, %v1350_v10  ;;  %vm1349_vm4 = vcmp.eq.f32.partialorder %v1348_v16, 8.507059e+37 }
 0x453   :  { %v2224_v29 = vpop.eup %2223 }
 0x454   :  { %v1358_v32 = vadd.f32 1.0, %v2224_v29 }
 0x455   :  { %v2226_v33 = vpop.eup %2225 }
 0x456   :  { %v2228_v45 = vpop.eup %2227  ;;  %v1321_v53 = vmul.f32 %v2226_v33, %v1319_v13  ;;  %2229 = vrcp.f32 %v1358_v32  ;;  %vm1326_vm13 = vweird.f32 %v2226_v33  ;;  %v1370_v12 = vand.u32 2147483648, %v1358_v32 }
 0x457   :  { %v1340_v58 = vmul.f32 %v2228_v45, %v1338_v14  ;;  %2231 = vtanh.f32 %v1314_v44  ;;  %vm1345_vm14 = vweird.f32 %v2228_v45  ;;  %vm1327_vm1 = vmor %vm1325_vm15, %vm1326_vm13  ;;  %vm1364_vm6 = vweird.f32 %v1358_v32 }
 0x458   :  { %v1322_v0 = vsub.f32 1.0, %v1321_v53  ;;  %vm1346_vm2 = vmor %vm1344_vm0, %vm1345_vm14  ;;  %v1368_v40 = vand.u32 2147483647, %v1358_v32  ;;  %v1371_v43 = vor.u32 1.1754944e-38, %v1370_v12 }
 0x459   :  { %v1341_v6 = vsub.f32 1.0, %v1340_v58 }
 0x45a   :  { %v1323_v9 = vmul.f32 %v2226_v33, %v1322_v0  ;;  %vm1369_vm8 = vcmp.eq.f32.partialorder %v1368_v40, 8.507059e+37 }
 0x45b   :  { %v1342_v56 = vmul.f32 %v2228_v45, %v1341_v6 }
 0x45c   :  { %v2230_v2 = vpop.eup %2229  ;;  %v1324_v39 = vadd.f32 %v2226_v33, %v1323_v9 }
 0x45d   :  { %v1343_v37 = vadd.f32 %v2228_v45, %v1342_v56  ;;  %v1360_v19 = vmul.f32 %v2230_v2, %v1358_v32  ;;  %v2232_v28 = vpop.eup %2231  ;;  %vm1365_vm5 = vweird.f32 %v2230_v2  ;;  %v1384_v32 = vunpack.c.l.bf16 %v3062_v46  ;;  %v3065_v46 = vld [vmem:[#allocation19_spill] sm:$0xff] }
 0x45e   :  { %v1328_v8 = vsel %vm1327_vm1, %v2226_v33, %v1324_v39  ;;  %vm1366_vm7 = vmor %vm1364_vm6, %vm1365_vm5 }
 0x45f   :  { %v1333_v52 = vsel %vm1330_vm3, %v1332_v50, %v1328_v8  ;;  %v1347_v7 = vsel %vm1346_vm2, %v2228_v45, %v1343_v37  ;;  %v1361_v17 = vsub.f32 1.0, %v1360_v19 }
 0x460   :  { %v1352_v48 = vsel %vm1349_vm4, %v1351_v62, %v1347_v7  ;;  %v1375_v5 = vmul.f32 %v2232_v28, %v1333_v52 }
 0x461   :  { %v1374_v27 = vmul.f32 %v1352_v48, %v2936_v41  ;;  %v1362_v47 = vmul.f32 %v2230_v2, %v1361_v17  ;;  %v3061_v41 = vld [vmem:[#allocation16_spill] sm:$0xff] }
 0x462   :  { %v1382_v23 = vunpack.c.l.bf16 %v3061_v41  ;;  %v1383_v24 = vunpack.c.h.bf16 %v3061_v41 }
 0x463   :  { %v2976_v57 = vadd.f32 %v1375_v5, %v1374_v27  ;;  %v1363_v36 = vadd.f32 %v2230_v2, %v1362_v47 }
 0x465   :  { %2233 = vtanh.f32 %v2976_v57  ;;  %v1367_v15 = vsel %vm1366_vm7, %v2230_v2, %v1363_v36 }
 0x466   :  { %v1372_v55 = vsel %vm1369_vm8, %v1371_v43, %v1367_v15 }
 0x46b   :  { %v2234_v11 = vpop.eup %2233 }
 0x46c   :  { %v1378_v21 = vmul.f32 %v2234_v11, %v1372_v55 }
 0x46e   :  { %v1386_v18 = vpack.c.bf16 %v1378_v21, %v1378_v21 }
 0x470   :  { %1395 = vmatmul.bf16.vlgmr.msrb.gmra.mxu0 %v1386_v18  ;;  %1408 = vmatmul.bf16.vlgmr.msrb.gmra.mxu1 %v1386_v18 }
 0x471   :  { %1421 = vmatmul.bf16.vlgmr.msra.gmra.mxu2 %v1386_v18  ;;  %1434 = vmatmul.bf16.vlgmr.msra.gmra.mxu3 %v1386_v18 }
 0x4ed   :  { %v1396_v26 = vpop.f32.mrf.mxu0  ;;  %v1409_v30 = vpop.f32.mrf.mxu1 }
 0x4ee   :  { %v1439_v34 = vadd.f32 %v1396_v26, %v1382_v23  ;;  %v1440_v35 = vadd.f32 %v1409_v30, %v1383_v24  ;;  %v2116_v24 = vld [vmem:[%s3031_s4 + $0x30] sm:$0xff]  ;;  %v3063_v26 = vld [vmem:[#allocation23_spill] sm:$0xff] }
 0x4ef   :  { %v324_v30 = vperm.slane %v3063_v26, 0 }
 0x4f0   :  { %v2008_v38 = vmul.f32 -1.442695, %v1439_v34  ;;  %v2009_v42 = vmul.f32 -1.442695, %v1440_v35  ;;  %v325_v34 = vperm.slane %v3063_v26, 1  ;;  %v2115_v35 = vld [vmem:[%s3031_s4 + $0x28] sm:$0xff] }
 0x4f2   :  { %2235 = vpow2.f32 %v2008_v38  ;;  %v3064_v38 = vld [vmem:[#allocation18_spill] sm:$0xff] }
 0x4f3   :  { %2237 = vpow2.f32 %v2009_v42  ;;  %v388_v42 = vadd.f32 %v324_v30, %v3064_v38 }
 0x4f4   :  { %v1422_v51 = vpop.f32.mrf.mxu2  ;;  %v1435_v54 = vpop.f32.mrf.mxu3 }
 0x4f5   :  { %v1442_v59 = vadd.f32 %v1435_v54, %v1385_v49  ;;  %v1398_v60 = vpop.f32.mrf.mxu0  ;;  %v1411_v61 = vpop.f32.mrf.mxu1  ;;  %v1441_v45 = vadd.f32 %v1422_v51, %v1384_v32  ;;  %v389_v49 = vadd.f32 %v325_v34, %v3065_v46  ;;  %v2114_v51 = vld [vmem:[%s3031_s4 + $0x20] sm:$0xff]  ;;  %v1512_v32 = vunpack.c.h.bf16 %v2774_v63 }
 0x4f7   :  { %v2010_v3 = vmul.f32 -1.442695, %v1442_v59  ;;  %v406_v54 = vpack.c.bf16 %v389_v49, %v388_v42  ;;  %v2113_v59 = vld [vmem:[%s3031_s4 + $0x18] sm:$0xff] }
 0x4f8   :  { %v2236_v4 = vpop.eup %2235 }
 0x4f9   :  { %v2238_v13 = vpop.eup %2237  ;;  %v1446_v14 = vadd.f32 1.0, %v2236_v4  ;;  %2239 = vpow2.f32 %v2010_v3  ;;  %v1509_v60 = vunpack.c.l.bf16 %v406_v54  ;;  %v1510_v61 = vunpack.c.h.bf16 %v406_v54 }
 0x4fa   :  { %v1465_v20 = vadd.f32 1.0, %v2238_v13 }
 0x4fb   :  { %2241 = vrcp.f32 %v1446_v14  ;;  %v1458_v10 = vand.u32 2147483648, %v1446_v14  ;;  %v1456_v56 = vand.u32 2147483647, %v1446_v14  ;;  %vm1452_vm11 = vweird.f32 %v1446_v14 }
 0x4fc   :  { %2243 = vrcp.f32 %v1465_v20  ;;  %v1424_v22 = vpop.f32.mrf.mxu2  ;;  %v1437_v29 = vpop.f32.mrf.mxu3  ;;  %v1477_v9 = vand.u32 2147483648, %v1465_v20  ;;  %v1475_v2 = vand.u32 2147483647, %v1465_v20  ;;  %vm1471_vm12 = vweird.f32 %v1465_v20 }
 0x4fd   :  { %v1459_v37 = vor.u32 1.1754944e-38, %v1458_v10  ;;  %vm1457_vm15 = vcmp.eq.f32.partialorder %v1456_v56, 8.507059e+37 }
 0x4fe   :  { %v1478_v8 = vor.u32 1.1754944e-38, %v1477_v9  ;;  %vm1476_vm0 = vcmp.eq.f32.partialorder %v1475_v2, 8.507059e+37  ;;  %v2125_v2 = vld [vmem:[#allocation10 + $0x38] sm:$0xff] }
 0x4ff   :  { %v2240_v31 = vpop.eup %2239  ;;  %1792 = vmatpush.bf16.msrb.mxu1 %v2125_v2 }
 0x500   :  { %v1485_v33 = vadd.f32 1.0, %v2240_v31  ;;  %v2111_v31 = vld [vmem:[%s3031_s4 + $0x8] sm:$0xff] }
 0x501   :  { %v2242_v44 = vpop.eup %2241 }
 0x502   :  { %v2244_v53 = vpop.eup %2243  ;;  %v1448_v58 = vmul.f32 %v2242_v44, %v1446_v14  ;;  %2245 = vrcp.f32 %v1485_v33  ;;  %vm1453_vm9 = vweird.f32 %v2242_v44  ;;  %v1497_v15 = vand.u32 2147483648, %v1485_v33 }
 0x503   :  { %v1467_v0 = vmul.f32 %v2244_v53, %v1465_v20  ;;  %2247 = vtanh.f32 %v1441_v45  ;;  %vm1472_vm10 = vweird.f32 %v2244_v53  ;;  %vm1454_vm13 = vmor %vm1452_vm11, %vm1453_vm9  ;;  %vm1491_vm2 = vweird.f32 %v1485_v33  ;;  %v2112_v20 = vld [vmem:[%s3031_s4 + $0x10] sm:$0xff] }
 0x504   :  { %v1449_v6 = vsub.f32 1.0, %v1448_v58  ;;  %vm1473_vm14 = vmor %vm1471_vm12, %vm1472_vm10  ;;  %v1495_v43 = vand.u32 2147483647, %v1485_v33  ;;  %v1498_v55 = vor.u32 1.1754944e-38, %v1497_v15  ;;  %v2122_v15 = vld [vmem:[#allocation10 + $0x20] sm:$0xff] }
 0x505   :  { %v1468_v25 = vsub.f32 1.0, %v1467_v0  ;;  %v2110_v0 = vld [vmem:[%s3031_s4] sm:$0xff] }
 0x506   :  { %v1450_v1 = vmul.f32 %v2242_v44, %v1449_v6  ;;  %vm1496_vm4 = vcmp.eq.f32.partialorder %v1495_v43, 8.507059e+37 }
 0x507   :  { %v1469_v16 = vmul.f32 %v2244_v53, %v1468_v25 }
 0x508   :  { %v2246_v39 = vpop.eup %2245  ;;  %v1451_v50 = vadd.f32 %v2242_v44, %v1450_v1 }
 0x509   :  { %v1470_v19 = vadd.f32 %v2244_v53, %v1469_v16  ;;  %v1487_v62 = vmul.f32 %v2246_v39, %v1485_v33  ;;  %v2248_v52 = vpop.eup %2247  ;;  %vm1492_vm1 = vweird.f32 %v2246_v39 }
 0x50a   :  { %v1455_v28 = vsel %vm1454_vm13, %v2242_v44, %v1451_v50  ;;  %vm1493_vm3 = vmor %vm1491_vm2, %vm1492_vm1 }
 0x50b   :  { %v1460_v7 = vsel %vm1457_vm15, %v1459_v37, %v1455_v28  ;;  %v1474_v17 = vsel %vm1473_vm14, %v2244_v53, %v1470_v19  ;;  %v1488_v48 = vsub.f32 1.0, %v1487_v62  ;;  %v1511_v37 = vunpack.c.l.bf16 %v2774_v63 }
 0x50c   :  { %v1479_v5 = vsel %vm1476_vm0, %v1478_v8, %v1474_v17  ;;  %v1502_v27 = vmul.f32 %v2248_v52, %v1460_v7  ;;  %v2123_v7 = vld [vmem:[#allocation10 + $0x28] sm:$0xff] }
 0x50d   :  { %v1501_v47 = vmul.f32 %v1479_v5, %v2976_v57  ;;  %v1489_v36 = vmul.f32 %v2246_v39, %v1488_v48  ;;  %v2117_v57 = vld [vmem:[%s3031_s4 + $0x38] sm:$0xff] }
 0x50e   :  { %1707 = vmatpush.bf16.msrb.mxu0 %v2117_v57 }
 0x50f   :  { %v2984_v12 = vadd.f32 %v1502_v27, %v1501_v47  ;;  %v1490_v40 = vadd.f32 %v2246_v39, %v1489_v36 }
 0x511   :  { %2249 = vtanh.f32 %v2984_v12  ;;  %v1494_v11 = vsel %vm1493_vm3, %v2246_v39, %v1490_v40  ;;  %v2124_v39 = vld [vmem:[#allocation10 + $0x30] sm:$0xff] }
 0x512   :  { %v1499_v18 = vsel %vm1496_vm4, %v1498_v55, %v1494_v11  ;;  %1708 = vmatpush.bf16.msrb.mxu0 %v2116_v24  ;;  %1793 = vmatpush.bf16.msrb.mxu1 %v2124_v39  ;;  %v2121_v24 = vld [vmem:[#allocation10 + $0x18] sm:$0xff] }
 0x516   :  { %1709 = vmatpush.bf16.msrb.mxu0 %v2115_v35  ;;  %1794 = vmatpush.bf16.msrb.mxu1 %v2123_v7 }
 0x517   :  { %v2250_v21 = vpop.eup %2249 }
 0x518   :  { %v1505_v41 = vmul.f32 %v2250_v21, %v1499_v18 }
 0x51a   :  { %v1513_v23 = vpack.c.bf16 %v1505_v41, %v1505_v41  ;;  %1710 = vmatpush.bf16.msrb.mxu0 %v2114_v51  ;;  %1795 = vmatpush.bf16.msrb.mxu1 %v2122_v15  ;;  %v2120_v51 = vld [vmem:[#allocation10 + $0x10] sm:$0xff] }
 0x51c   :  { %1522 = vmatmul.bf16.vlgmr.msra.gmra.mxu0 %v1513_v23  ;;  %1535 = vmatmul.bf16.vlgmr.msra.gmra.mxu1 %v1513_v23 }
 0x51d   :  { %1548 = vmatmul.bf16.vlgmr.msrb.gmra.mxu2 %v1513_v23  ;;  %1561 = vmatmul.bf16.vlgmr.msrb.gmra.mxu3 %v1513_v23 }
 0x51e   :  { %1711 = vmatpush.bf16.msrb.mxu0 %v2113_v59  ;;  %1796 = vmatpush.bf16.msrb.mxu1 %v2121_v24 }
 0x522   :  { %1712 = vmatpush.bf16.msrb.mxu0 %v2112_v20  ;;  %1797 = vmatpush.bf16.msrb.mxu1 %v2120_v51 }
 0x526   :  { %1713 = vmatpush.bf16.msrb.mxu0 %v2111_v31  ;;  %v2137_v31 = vld [vmem:[%s3032_s5] ss:$0 sm:$0xff]  ;;  %s2381_s5 = smov [#allocation11]  }
 0x52a   :  { %1714 = vmatpush.bf16.msrb.mxu0 %v2110_v0  ;;  %v2138_v0 = vld [vmem:[%s3034_s7] ss:$0 sm:$0xff]  ;;  %s1833_s7 = sshll.u32 %s2381_s5, 4  ;;  %s1834_s7 = int_to_ptr.vmem [resolvable:$true] %s1833_s7 }
 0x599   :  { %v1523_v3 = vpop.f32.mrf.mxu0  ;;  %v1536_v4 = vpop.f32.mrf.mxu1 }
 0x59a   :  { %v1566_v13 = vadd.f32 %v1523_v3, %v1509_v60  ;;  %v1567_v14 = vadd.f32 %v1536_v4, %v1510_v61 }
 0x59c   :  { %v2011_v22 = vmul.f32 -1.442695, %v1566_v13  ;;  %v2012_v29 = vmul.f32 -1.442695, %v1567_v14 }
 0x59e   :  { %2251 = vpow2.f32 %v2011_v22 }
 0x59f   :  { %2253 = vpow2.f32 %v2012_v29  ;;  %v2118_v29 = vld [vmem:[#allocation10] sm:$0xff] }
 0x5a0   :  { %v1549_v33 = vpop.f32.mrf.mxu2  ;;  %v1562_v44 = vpop.f32.mrf.mxu3 }
 0x5a1   :  { %v1569_v45 = vadd.f32 %v1562_v44, %v1512_v32  ;;  %v1525_v53 = vpop.f32.mrf.mxu0  ;;  %v1538_v58 = vpop.f32.mrf.mxu1  ;;  %v1568_v8 = vadd.f32 %v1549_v33, %v1511_v37 }
 0x5a3   :  { %v2013_v6 = vmul.f32 -1.442695, %v1569_v45 }
 0x5a4   :  { %v2252_v25 = vpop.eup %2251 }
 0x5a5   :  { %v2254_v10 = vpop.eup %2253  ;;  %v1573_v9 = vadd.f32 1.0, %v2252_v25  ;;  %2255 = vpow2.f32 %v2013_v6 }
 0x5a6   :  { %v1592_v1 = vadd.f32 1.0, %v2254_v10 }
 0x5a7   :  { %2257 = vrcp.f32 %v1573_v9  ;;  %v1585_v27 = vand.u32 2147483648, %v1573_v9  ;;  %v1583_v40 = vand.u32 2147483647, %v1573_v9  ;;  %vm1579_vm7 = vweird.f32 %v1573_v9 }
 0x5a8   :  { %2259 = vrcp.f32 %v1592_v1  ;;  %v1551_v56 = vpop.f32.mrf.mxu2  ;;  %v1564_v16 = vpop.f32.mrf.mxu3  ;;  %v1604_v47 = vand.u32 2147483648, %v1592_v1  ;;  %v1602_v43 = vand.u32 2147483647, %v1592_v1  ;;  %vm1598_vm8 = vweird.f32 %v1592_v1 }
 0x5a9   :  { %v1586_v21 = vor.u32 1.1754944e-38, %v1585_v27  ;;  %vm1584_vm11 = vcmp.eq.f32.partialorder %v1583_v40, 8.507059e+37 }
 0x5aa   :  { %v1605_v23 = vor.u32 1.1754944e-38, %v1604_v47  ;;  %vm1603_vm12 = vcmp.eq.f32.partialorder %v1602_v43, 8.507059e+37 }
 0x5ab   :  { %v2256_v50 = vpop.eup %2255 }
 0x5ac   :  { %v1612_v19 = vadd.f32 1.0, %v2256_v50 }
 0x5ad   :  { %v2258_v62 = vpop.eup %2257 }
 0x5ae   :  { %v2260_v28 = vpop.eup %2259  ;;  %v1575_v52 = vmul.f32 %v2258_v62, %v1573_v9  ;;  %2261 = vrcp.f32 %v1612_v19  ;;  %vm1580_vm5 = vweird.f32 %v2258_v62  ;;  %v1624_v60 = vand.u32 2147483648, %v1612_v19 }
 0x5af   :  { %v1594_v17 = vmul.f32 %v2260_v28, %v1592_v1  ;;  %2263 = vtanh.f32 %v1568_v8  ;;  %vm1599_vm6 = vweird.f32 %v2260_v28  ;;  %vm1581_vm9 = vmor %vm1579_vm7, %vm1580_vm5  ;;  %vm1618_vm14 = vweird.f32 %v1612_v19 }
 0x5b0   :  { %v1576_v48 = vsub.f32 1.0, %v1575_v52  ;;  %vm1600_vm10 = vmor %vm1598_vm8, %vm1599_vm6  ;;  %v1622_v61 = vand.u32 2147483647, %v1612_v19  ;;  %v1625_v4 = vor.u32 1.1754944e-38, %v1624_v60 }
 0x5b1   :  { %v1595_v5 = vsub.f32 1.0, %v1594_v17 }
 0x5b2   :  { %v1577_v36 = vmul.f32 %v2258_v62, %v1576_v48  ;;  %vm1623_vm0 = vcmp.eq.f32.partialorder %v1622_v61, 8.507059e+37 }
 0x5b3   :  { %v1596_v63 = vmul.f32 %v2260_v28, %v1595_v5 }
 0x5b4   :  { %v2262_v11 = vpop.eup %2261  ;;  %v1578_v55 = vadd.f32 %v2258_v62, %v1577_v36 }
 0x5b5   :  { %v1597_v18 = vadd.f32 %v2260_v28, %v1596_v63  ;;  %v1614_v41 = vmul.f32 %v2262_v11, %v1612_v19  ;;  %v2264_v26 = vpop.eup %2263  ;;  %vm1619_vm13 = vweird.f32 %v2262_v11 }
 0x5b6   :  { %v1582_v57 = vsel %vm1581_vm9, %v2258_v62, %v1578_v55  ;;  %vm1620_vm15 = vmor %vm1618_vm14, %vm1619_vm13 }
 0x5b7   :  { %v1587_v30 = vsel %vm1584_vm11, %v1586_v21, %v1582_v57  ;;  %v1601_v34 = vsel %vm1600_vm10, %v2260_v28, %v1597_v18  ;;  %v1615_v35 = vsub.f32 1.0, %v1614_v41 }
 0x5b8   :  { %v1606_v38 = vsel %vm1603_vm12, %v1605_v23, %v1601_v34  ;;  %v1629_v42 = vmul.f32 %v2264_v26, %v1587_v30 }
 0x5b9   :  { %v1628_v46 = vmul.f32 %v1606_v38, %v2984_v12  ;;  %v1616_v49 = vmul.f32 %v2262_v11, %v1615_v35  ;;  %v2119_v12 = vld [vmem:[#allocation10 + $0x8] sm:$0xff] }
 0x5ba   :  { %1798 = vmatpush.bf16.msrb.mxu1 %v2119_v12 }
 0x5bb   :  { %v1630_v54 = vadd.f32 %v1629_v42, %v1628_v46  ;;  %v1617_v59 = vadd.f32 %v2262_v11, %v1616_v49 }
 0x5bd   :  { %2265 = vtanh.f32 %v1630_v54  ;;  %v1621_v3 = vsel %vm1620_vm15, %v2262_v11, %v1617_v59 }
 0x5be   :  { %v1626_v14 = vsel %vm1623_vm0, %v1625_v4, %v1621_v3  ;;  %1799 = vmatpush.bf16.msrb.mxu1 %v2118_v29 }
 0x5c3   :  { %v2266_v13 = vpop.eup %2265 }
 0x5c4   :  { %v1632_v20 = vmul.f32 %v2266_v13, %v1626_v14 }
 0x5c6   :  { %v1638_v22 = vpack.c.bf16 %v1632_v20, %v1632_v20 }
 0x5c8   :  { %1715 = vmatmul.bf16.vlgmr.msrb.gmra.mxu0 %v1638_v22 }
 0x645   :  { %v1716_v32 = vpop.f32.mrf.mxu0 }
 0x646   :  { %v1717_v33 = vadd.f32 %v2137_v31, %v1716_v32 }
 0x648   :  { %vm1720_vm1 = vcmp.ge.f32.partialorder %v1717_v33, 0.0  ;;  %v1721_v44 = vmul.f32 0.1, %v1717_v33 }
 0x64a   :  { %v1722_v45 = vsel %vm1720_vm1, %v1717_v33, %v1721_v44 }
 0x64b   :  { %v1723_v53 = vpack.c.bf16 %v1722_v45, %v1722_v45 }
 0x64d   :  { %v1718_v58 = vpop.f32.mrf.mxu0  ;;  %1800 = vmatmul.bf16.vlgmr.msrb.gmra.mxu1 %v1723_v53 }
 0x6ca   :  { %v1801_v6 = vpop.f32.mrf.mxu1 }
 0x6cb   :  { %v1802_v25 = vadd.f32 %v2138_v0, %v1801_v6 }
 0x6cd   :  { %1805 = vmax.xlane.f32.xlu0 %v1802_v25 }
 0x6d2   :  { %v1803_v10 = vpop.f32.mrf.mxu1 }
 0x740   :  { %v1806_v9 = vpop.xlane.xlu0 %1805 }
 0x741   :  { %v1807_v1 = vsub.f32 %v1802_v25, %v1806_v9 }
 0x743   :  { %v1808_v56 = vmul.f32 1.442695, %v1807_v1 }
 0x745   :  { %2267 = vpow2.f32 %v1808_v56 }
 0x74b   :  { %v2268_v16 = vpop.eup %2267 }
 0x74c   :  { %1810 = vadd.xlane.f32.xlu0 %v2268_v16 }
 0x7bf   :  { %v1811_v2 = vpop.xlane.xlu0 %1810 }
 0x7c0   :  { %2269 = vrcp.f32 %v1811_v2  ;;  %v1823_v19 = vand.u32 2147483648, %v1811_v2  ;;  %v1821_v8 = vand.u32 2147483647, %v1811_v2  ;;  %vm1817_vm3 = vweird.f32 %v1811_v2 }
 0x7c2   :  { %v1824_v52 = vor.u32 1.1754944e-38, %v1823_v19  ;;  %vm1822_vm5 = vcmp.eq.f32.partialorder %v1821_v8, 8.507059e+37 }
 0x7c6   :  { %v2270_v39 = vpop.eup %2269 }
 0x7c7   :  { %v1813_v50 = vmul.f32 %v2270_v39, %v1811_v2  ;;  %vm1818_vm2 = vweird.f32 %v2270_v39 }
 0x7c8   :  { %vm1819_vm4 = vmor %vm1817_vm3, %vm1818_vm2 }
 0x7c9   :  { %v1814_v37 = vsub.f32 1.0, %v1813_v50 }
 0x7cb   :  { %v1815_v62 = vmul.f32 %v2270_v39, %v1814_v37 }
 0x7cd   :  { %v1816_v28 = vadd.f32 %v2270_v39, %v1815_v62 }
 0x7cf   :  { %v1820_v7 = vsel %vm1819_vm4, %v2270_v39, %v1816_v28 }
 0x7d0   :  { %v1825_v17 = vsel %vm1822_vm5, %v1824_v52, %v1820_v7 }
 0x7d1   :  { %v1826_v48 = vmul.f32 %v2268_v16, %v1825_v17 }
 0x7d3   :  { %1827 = vst [vmem:[#allocation11] sm:$0xff] %v1826_v48 }
 0x7d4   :  { %1838 = dma.vmem_to_hbm [thread:$0]  %s1834_s7, 128, %s1836_s16, [#allocation7]  }
 0x7d5   :  { %2371 = dma.done.wait [#allocation7], 128  }
 0x7d6   :  { %2372 = vsyncadd [#allocation7], 4294967168 }
 0x7d7   :  { %1843 = vsyncpa [#allocation6], 1 }
 0x7d8   :  { %1844 = vsyncpa [#allocation9], 1 }
 0x7d9   :  { %1845 = vsyncpa [#allocation7], 1 }

</bundles_post_ra>
